<compile_context>
chip_gen: v7x
topology: tpu7x:2x2x1
jax: 0.10.0
libtpu: 0.0.40
codegen_flags: <defaults>
</compile_context>

<pallas_src>
import jax
import jax.numpy as jnp
import numpy as np
from jax.experimental import pallas as pl
from jax.experimental.pallas import tpu as pltpu


def make_mdn_kernel(n_layers, n_gaussians):
    """Kernel body for a fixed number of hidden (Linear+Tanh) layers + fused heads."""

    def kernel(*refs):
        # refs layout:
        #   x_ref,
        #   (w_ref, b_ref) * n_layers,            # z_h trunk
        #   w_heads_ref, b_heads_ref,             # fused [pi|sigma|mu|pad] head
        #   out_ref                               # combined (tb, n_head_pad) output
        x_ref = refs[0]
        idx = 1
        h = x_ref[...]
        # z_h: Linear -> Tanh, repeated n_layers times (f32 accumulate + f32 tanh)
        for _ in range(n_layers):
            w = refs[idx][...]
            b = refs[idx + 1][...]
            idx += 2
            h = jnp.tanh(
                jnp.dot(h.astype(w.dtype), w, preferred_element_type=jnp.float32)
                + b.astype(jnp.float32)
            )

        w_heads = refs[idx][...]
        b_heads = refs[idx + 1][...]
        out_ref = refs[idx + 2]

        # Single fused head matmul: columns are [pi | sigma | mu | zero-pad].
        z = jnp.dot(h.astype(w_heads.dtype), w_heads,
                    preferred_element_type=jnp.float32) + b_heads.astype(jnp.float32)

        col = jax.lax.broadcasted_iota(jnp.int32, z.shape, dimension=1)
        is_pi = col < n_gaussians
        is_sigma = (col >= n_gaussians) & (col < 2 * n_gaussians)
        is_mu = (col >= 2 * n_gaussians) & (col < 3 * n_gaussians)

        # Softmax over the pi columns only (padded / sigma / mu lanes masked out).
        m = jnp.max(jnp.where(is_pi, z, -1e30), axis=-1, keepdims=True)
        # One EUP exp pass: exp(z - m) on pi columns, plain exp(z) elsewhere
        # (the latter is exactly what the sigma columns need).
        e = jnp.exp(z - jnp.where(is_pi, m, 0.0))
        e_pi = jnp.where(is_pi, e, 0.0)
        denom = jnp.sum(e_pi, axis=-1, keepdims=True)
        inv = pl.reciprocal(denom, approx=True)       # EUP slot
        inv = inv * (2.0 - denom * inv)               # one Newton step -> ~f32 exact
        pi_vals = e_pi * inv

        out = jnp.where(is_pi, pi_vals,
                        jnp.where(is_sigma, e,
                                  jnp.where(is_mu, z, 0.0)))
        out_ref[...] = out  # single lane-dense (tb, n_head_pad) store

    return kernel


def mdn_forward(x, params, *, n_layers, tb=256, matmul_dtype=jnp.float32):
    """params: dict with 'hidden' = [(W,b), ...] and 'pi'/'sigma'/'mu' = (W,b).

    matmul_dtype=jnp.bfloat16 feeds the MXU bf16 (f32 accumulation, f32
    elementwise) — recommended on v6e/v7x; keep float32 on v5e or for
    tight-tolerance checks.
    """
    B, n_input = x.shape
    n_hidden = params["hidden"][0][0].shape[1]
    n_gaussians = params["pi"][0].shape[1]

    tb = min(tb, B)
    assert B % tb == 0, f"batch {B} must be divisible by tile {tb}"

    n_head = 3 * n_gaussians
    n_head_pad = ((n_head + 127) // 128) * 128  # lane-dense output width

    # Fused, zero-padded head weight/bias: columns [pi | sigma | mu | pad].
    w_heads = jnp.zeros((n_hidden, n_head_pad), jnp.float32)
    b_heads = jnp.zeros((1, n_head_pad), jnp.float32)
    off = 0
    for name in ("pi", "sigma", "mu"):
        w, b = params[name]
        w_heads = w_heads.at[:, off:off + n_gaussians].set(w)
        b_heads = b_heads.at[:, off:off + n_gaussians].set(b.reshape(1, -1))
        off += n_gaussians

    # Flatten parameters in kernel order (weights in matmul_dtype, biases f32).
    flat_params = []
    for (w, b) in params["hidden"]:
        flat_params += [w.astype(matmul_dtype), b.reshape(1, -1).astype(jnp.float32)]
    flat_params += [w_heads.astype(matmul_dtype), b_heads]

    # BlockSpecs: x / output tiled over batch; weights & biases loaded whole.
    x_spec = pl.BlockSpec((tb, n_input), lambda i: (i, 0))
    full = lambda arr: pl.BlockSpec(arr.shape, lambda i: (0, 0))
    param_specs = [full(p) for p in flat_params]
    out_spec = pl.BlockSpec((tb, n_head_pad), lambda i: (i, 0))

    kernel = make_mdn_kernel(n_layers, n_gaussians)

    # VMEM footprint at these shapes is tiny (<1 MiB even double-buffered), so
    # the default scoped VMEM limit is fine; set vmem_limit_bytes if scaled up.
    combined = pl.pallas_call(
        kernel,
        out_shape=jax.ShapeDtypeStruct((B, n_head_pad), jnp.float32),
        grid_spec=pltpu.PrefetchScalarGridSpec(
            num_scalar_prefetch=0,
            grid=(B // tb,),
            in_specs=[x_spec] + param_specs,
            out_specs=out_spec,
        ),
        compiler_params=pltpu.CompilerParams(
            dimension_semantics=("parallel",),
        ),
    )(x, *flat_params)

    pi = combined[:, 0:n_gaussians]
    sigma = combined[:, n_gaussians:2 * n_gaussians]
    mu = combined[:, 2 * n_gaussians:3 * n_gaussians]
    return pi, sigma, mu


def init_params(key, n_input, n_hidden, n_layers, n_gaussians):
    """Deterministic init mimicking PyTorch's default Linear init (uniform ±1/sqrt(fan_in))."""

    def linear(key, fan_in, fan_out):
        kw, kb = jax.random.split(key)
        bound = 1.0 / np.sqrt(fan_in)
        w = jax.random.uniform(kw, (fan_in, fan_out), jnp.float32, -bound, bound)
        b = jax.random.uniform(kb, (fan_out,), jnp.float32, -bound, bound)
        return w, b

    keys = jax.random.split(key, n_layers + 3)
    hidden = []
    fan_in = n_input
    for l in range(n_layers):
        hidden.append(linear(keys[l], fan_in, n_hidden))
        fan_in = n_hidden
    return {
        "hidden": hidden,
        "pi": linear(keys[n_layers], n_hidden, n_gaussians),
        "sigma": linear(keys[n_layers + 1], n_hidden, n_gaussians),
        "mu": linear(keys[n_layers + 2], n_hidden, n_gaussians),
    }


def mdn_ref(x, params):
    """Pure-JAX reference of the PyTorch forward."""
    h = x
    for (w, b) in params["hidden"]:
        h = jnp.tanh(h @ w + b)
    wpi, bpi = params["pi"]
    wsig, bsig = params["sigma"]
    wmu, bmu = params["mu"]
    pi = jax.nn.softmax(h @ wpi + bpi, axis=-1)
    sigma = jnp.exp(h @ wsig + bsig)
    mu = h @ wmu + bmu
    return pi, sigma, mu


if __name__ == "__main__":
    # Shapes consistent with the module's forward: x is [batch, n_input].
    # B chosen so tb=256 gives >= 2 parallel grid steps (both v7x TCs get work).
    n_input, n_hidden, n_layers, n_gaussians = 4, 32, 2, 5
    B = 512

    key = jax.random.PRNGKey(0)
    kx, kp = jax.random.split(key)
    x = jax.random.normal(kx, (B, n_input), jnp.float32)
    params = init_params(kp, n_input, n_hidden, n_layers, n_gaussians)

    pi_r, sigma_r, mu_r = mdn_ref(x, params)

    # f32 matmul path: tight correctness check.
    pi, sigma, mu = mdn_forward(x, params, n_layers=n_layers, tb=256,
                                matmul_dtype=jnp.float32)
    jax.block_until_ready((pi, sigma, mu))
    assert np.allclose(np.asarray(pi), np.asarray(pi_r), atol=1e-5)
    assert np.allclose(np.asarray(sigma), np.asarray(sigma_r), atol=1e-5)
    assert np.allclose(np.asarray(mu), np.asarray(mu_r), atol=1e-5)

    # bf16 matmul path (v6e/v7x recommendation): f32 accumulate + f32 elementwise,
    # loose tolerance vs. the pure-f32 reference.
    pi_b, sigma_b, mu_b = mdn_forward(x, params, n_layers=n_layers, tb=256,
                                      matmul_dtype=jnp.bfloat16)
    jax.block_until_ready((pi_b, sigma_b, mu_b))
    assert np.allclose(np.asarray(pi_b), np.asarray(pi_r), atol=5e-2, rtol=5e-2)
    assert np.allclose(np.asarray(sigma_b), np.asarray(sigma_r), atol=5e-2, rtol=5e-2)
    assert np.allclose(np.asarray(mu_b), np.asarray(mu_r), atol=5e-2, rtol=5e-2)

    print("KERNEL_OK")
</pallas_src>

<mosaic_0001>
module attributes {stable_mosaic.version = 11 : i64} {
  func.func @kernel(%arg0: i32, %arg1: memref<256x4xf32, #tpu.memory_space<vmem>>, %arg2: memref<4x32xf32, #tpu.memory_space<vmem>>, %arg3: memref<1x32xf32, #tpu.memory_space<vmem>>, %arg4: memref<32x32xf32, #tpu.memory_space<vmem>>, %arg5: memref<1x32xf32, #tpu.memory_space<vmem>>, %arg6: memref<32x128xf32, #tpu.memory_space<vmem>>, %arg7: memref<1x128xf32, #tpu.memory_space<vmem>>, %arg8: memref<256x128xf32, #tpu.memory_space<vmem>>) attributes {dimension_semantics = [#tpu.dimension_semantics<parallel>], iteration_bounds = array<i64: 2>, scalar_prefetch = 0 : i64, scratch_operands = 0 : i64, tpu.core_type = #tpu.core_type<tc>, window_params = [{transform_indices = @transform_0, window_bounds = array<i64: 256, 4>}, {pipeline_mode = #tpu.pipeline_mode<synchronous>, transform_indices = @transform_1, window_bounds = array<i64: 4, 32>}, {pipeline_mode = #tpu.pipeline_mode<synchronous>, transform_indices = @transform_2, window_bounds = array<i64: 1, 32>}, {pipeline_mode = #tpu.pipeline_mode<synchronous>, transform_indices = @transform_3, window_bounds = array<i64: 32, 32>}, {pipeline_mode = #tpu.pipeline_mode<synchronous>, transform_indices = @transform_4, window_bounds = array<i64: 1, 32>}, {pipeline_mode = #tpu.pipeline_mode<synchronous>, transform_indices = @transform_5, window_bounds = array<i64: 32, 128>}, {pipeline_mode = #tpu.pipeline_mode<synchronous>, transform_indices = @transform_6, window_bounds = array<i64: 1, 128>}, {transform_indices = @transform_7, window_bounds = array<i64: 256, 128>}]} {
    %c0 = arith.constant 0 : index
    %c0_0 = arith.constant 0 : index
    %0 = vector.load %arg1[%c0, %c0_0] : memref<256x4xf32, #tpu.memory_space<vmem>>, vector<256x4xf32>
    %c0_1 = arith.constant 0 : index
    %c0_2 = arith.constant 0 : index
    %1 = vector.load %arg2[%c0_1, %c0_2] : memref<4x32xf32, #tpu.memory_space<vmem>>, vector<4x32xf32>
    %c0_3 = arith.constant 0 : index
    %c0_4 = arith.constant 0 : index
    %2 = vector.load %arg3[%c0_3, %c0_4] : memref<1x32xf32, #tpu.memory_space<vmem>>, vector<1x32xf32>
    %cst = arith.constant dense<0.000000e+00> : vector<256x32xf32>
    %3 = tpu.matmul %0, %1, %cst {dimension_numbers = #tpu.dot_dimension_numbers<[1], [0], [0], [1], [0, 0, 1, 1], [], []>} : vector<256x4xf32>, vector<4x32xf32>, vector<256x32xf32> -> vector<256x32xf32>
    %4 = vector.broadcast %2 : vector<1x32xf32> to vector<256x32xf32>
    %5 = arith.addf %3, %4 : vector<256x32xf32>
    %6 = math.tanh %5 : vector<256x32xf32>
    %c0_5 = arith.constant 0 : index
    %c0_6 = arith.constant 0 : index
    %7 = vector.load %arg4[%c0_5, %c0_6] : memref<32x32xf32, #tpu.memory_space<vmem>>, vector<32x32xf32>
    %c0_7 = arith.constant 0 : index
    %c0_8 = arith.constant 0 : index
    %8 = vector.load %arg5[%c0_7, %c0_8] : memref<1x32xf32, #tpu.memory_space<vmem>>, vector<1x32xf32>
    %cst_9 = arith.constant dense<0.000000e+00> : vector<256x32xf32>
    %9 = tpu.matmul %6, %7, %cst_9 {dimension_numbers = #tpu.dot_dimension_numbers<[1], [0], [0], [1], [0, 0, 1, 1], [], []>} : vector<256x32xf32>, vector<32x32xf32>, vector<256x32xf32> -> vector<256x32xf32>
    %10 = vector.broadcast %8 : vector<1x32xf32> to vector<256x32xf32>
    %11 = arith.addf %9, %10 : vector<256x32xf32>
    %12 = math.tanh %11 : vector<256x32xf32>
    %c0_10 = arith.constant 0 : index
    %c0_11 = arith.constant 0 : index
    %13 = vector.load %arg6[%c0_10, %c0_11] : memref<32x128xf32, #tpu.memory_space<vmem>>, vector<32x128xf32>
    %c0_12 = arith.constant 0 : index
    %c0_13 = arith.constant 0 : index
    %14 = vector.load %arg7[%c0_12, %c0_13] : memref<1x128xf32, #tpu.memory_space<vmem>>, vector<1x128xf32>
    %cst_14 = arith.constant dense<0.000000e+00> : vector<256x128xf32>
    %15 = tpu.matmul %12, %13, %cst_14 {dimension_numbers = #tpu.dot_dimension_numbers<[1], [0], [0], [1], [0, 0, 1, 1], [], []>} : vector<256x32xf32>, vector<32x128xf32>, vector<256x128xf32> -> vector<256x128xf32>
    %16 = vector.broadcast %14 : vector<1x128xf32> to vector<256x128xf32>
    %17 = arith.addf %15, %16 : vector<256x128xf32>
    %18 = tpu.iota {dimensions = array<i32: 1>} : vector<256x128xi32>
    %c5_i32 = arith.constant 5 : i32
    %19 = vector.broadcast %c5_i32 : i32 to vector<256x128xi32>
    %20 = arith.cmpi slt, %18, %19 : vector<256x128xi32>
    %c5_i32_15 = arith.constant 5 : i32
    %21 = vector.broadcast %c5_i32_15 : i32 to vector<256x128xi32>
    %22 = arith.cmpi sge, %18, %21 : vector<256x128xi32>
    %c10_i32 = arith.constant 10 : i32
    %23 = vector.broadcast %c10_i32 : i32 to vector<256x128xi32>
    %24 = arith.cmpi slt, %18, %23 : vector<256x128xi32>
    %25 = arith.andi %22, %24 : vector<256x128xi1>
    %c10_i32_16 = arith.constant 10 : i32
    %26 = vector.broadcast %c10_i32_16 : i32 to vector<256x128xi32>
    %27 = arith.cmpi sge, %18, %26 : vector<256x128xi32>
    %c15_i32 = arith.constant 15 : i32
    %28 = vector.broadcast %c15_i32 : i32 to vector<256x128xi32>
    %29 = arith.cmpi slt, %18, %28 : vector<256x128xi32>
    %30 = arith.andi %27, %29 : vector<256x128xi1>
    %cst_17 = arith.constant -1.000000e+30 : f32
    %31 = vector.broadcast %cst_17 : f32 to vector<256x128xf32>
    %32 = arith.select %20, %17, %31 : vector<256x128xi1>, vector<256x128xf32>
    %cst_18 = arith.constant dense<0xFF800000> : vector<256xf32>
    %33 = vector.multi_reduction <maximumf>, %32, %cst_18 [1] : vector<256x128xf32> to vector<256xf32>
    %34 = vector.shape_cast %33 : vector<256xf32> to vector<256x1xf32>
    %cst_19 = arith.constant 0.000000e+00 : f32
    %35 = vector.shape_cast %34 : vector<256x1xf32> to vector<256x1xf32>
    %36 = vector.broadcast %35 : vector<256x1xf32> to vector<256x128xf32>
    %37 = vector.broadcast %cst_19 : f32 to vector<256x128xf32>
    %38 = arith.select %20, %36, %37 : vector<256x128xi1>, vector<256x128xf32>
    %39 = arith.subf %17, %38 : vector<256x128xf32>
    %40 = math.exp %39 : vector<256x128xf32>
    %cst_20 = arith.constant 0.000000e+00 : f32
    %41 = vector.broadcast %cst_20 : f32 to vector<256x128xf32>
    %42 = arith.select %20, %40, %41 : vector<256x128xi1>, vector<256x128xf32>
    %cst_21 = arith.constant dense<0.000000e+00> : vector<256xf32>
    %43 = vector.multi_reduction <add>, %42, %cst_21 [1] : vector<256x128xf32> to vector<256xf32>
    %44 = vector.shape_cast %43 : vector<256xf32> to vector<256x1xf32>
    %45 = tpu.reciprocal %44 {approx = true} : vector<256x1xf32> -> vector<256x1xf32>
    %46 = arith.mulf %44, %45 : vector<256x1xf32>
    %cst_22 = arith.constant 2.000000e+00 : f32
    %47 = vector.broadcast %cst_22 : f32 to vector<256x1xf32>
    %48 = arith.subf %47, %46 : vector<256x1xf32>
    %49 = arith.mulf %45, %48 : vector<256x1xf32>
    %50 = vector.broadcast %49 : vector<256x1xf32> to vector<256x128xf32>
    %51 = arith.mulf %42, %50 : vector<256x128xf32>
    %cst_23 = arith.constant 0.000000e+00 : f32
    %52 = vector.broadcast %cst_23 : f32 to vector<256x128xf32>
    %53 = arith.select %30, %17, %52 : vector<256x128xi1>, vector<256x128xf32>
    %54 = arith.select %25, %40, %53 : vector<256x128xi1>, vector<256x128xf32>
    %55 = arith.select %20, %51, %54 : vector<256x128xi1>, vector<256x128xf32>
    %c0_24 = arith.constant 0 : index
    %c0_25 = arith.constant 0 : index
    %56 = vector.load %arg8[%c0_24, %c0_25] : memref<256x128xf32, #tpu.memory_space<vmem>>, vector<256x128xf32>
    tpu.vector_store %arg8[%c0_24, %c0_25], %55 {strides = array<i32>} : memref<256x128xf32, #tpu.memory_space<vmem>>, vector<256x128xf32>,
    return
  }
  func.func @transform_0(%arg0: i32) -> (i32, i32) {
    %c0_i32 = arith.constant 0 : i32
    %c0_i32_0 = arith.constant 0 : i32
    return %arg0, %c0_i32 : i32, i32
  }
  func.func @transform_1(%arg0: i32) -> (i32, i32) {
    %c0_i32 = arith.constant 0 : i32
    %c0_i32_0 = arith.constant 0 : i32
    %c0_i32_1 = arith.constant 0 : i32
    return %c0_i32, %c0_i32_0 : i32, i32
  }
  func.func @transform_2(%arg0: i32) -> (i32, i32) {
    %c0_i32 = arith.constant 0 : i32
    %c0_i32_0 = arith.constant 0 : i32
    %c0_i32_1 = arith.constant 0 : i32
    return %c0_i32, %c0_i32_0 : i32, i32
  }
  func.func @transform_3(%arg0: i32) -> (i32, i32) {
    %c0_i32 = arith.constant 0 : i32
    %c0_i32_0 = arith.constant 0 : i32
    %c0_i32_1 = arith.constant 0 : i32
    return %c0_i32, %c0_i32_0 : i32, i32
  }
  func.func @transform_4(%arg0: i32) -> (i32, i32) {
    %c0_i32 = arith.constant 0 : i32
    %c0_i32_0 = arith.constant 0 : i32
    %c0_i32_1 = arith.constant 0 : i32
    return %c0_i32, %c0_i32_0 : i32, i32
  }
  func.func @transform_5(%arg0: i32) -> (i32, i32) {
    %c0_i32 = arith.constant 0 : i32
    %c0_i32_0 = arith.constant 0 : i32
    %c0_i32_1 = arith.constant 0 : i32
    return %c0_i32, %c0_i32_0 : i32, i32
  }
  func.func @transform_6(%arg0: i32) -> (i32, i32) {
    %c0_i32 = arith.constant 0 : i32
    %c0_i32_0 = arith.constant 0 : i32
    %c0_i32_1 = arith.constant 0 : i32
    return %c0_i32, %c0_i32_0 : i32, i32
  }
  func.func @transform_7(%arg0: i32) -> (i32, i32) {
    %c0_i32 = arith.constant 0 : i32
    %c0_i32_0 = arith.constant 0 : i32
    return %arg0, %c0_i32 : i32, i32
  }
}

</mosaic_0001>

<bundles_post_ra>
// kernel: tpu_custom_call.1
= control target key start
LH: loop header
LB: loop body
LE: loop exit
PB: predicated region body
PF: predicated region fallthrough
CT: control target
= control target key end

     0   :  { %12 = vsyncpa [#allocation3], 0  ;;  %s4183_s0 = inlined_call_operand.vmem [shape: f32[512,4], index: 0, kind: input, shape index: {}]   ;;  %s4184_s1 = inlined_call_operand.vmem [shape: f32[4,32], index: 1, kind: input, shape index: {}]   ;;  %s4185_s2 = inlined_call_operand.vmem [shape: f32[1,32], index: 2, kind: input, shape index: {}]   ;;  %s4186_s3 = inlined_call_operand.vmem [shape: f32[32,32], index: 3, kind: input, shape index: {}]   ;;  %s4187_s4 = inlined_call_operand.vmem [shape: f32[1,32], index: 4, kind: input, shape index: {}]   ;;  %s4188_s5 = inlined_call_operand.vmem [shape: f32[32,128], index: 5, kind: input, shape index: {}]   ;;  %s4189_s6 = inlined_call_operand.vmem [shape: f32[1,128], index: 6, kind: input, shape index: {}]   ;;  %s4190_s7 = inlined_call_operand.hbm [shape: f32[512,128], index: 7, kind: output, shape index: {}]  }
   0x1   :  { %14 = vsyncpa [#allocation3 + $0x1], 0  ;;  %s2870_s24 = smov 0   ;;  %s2872_s25 = smov 0  }
   0x2   :  { %s2874_s26 = smov 0   ;;  %s2876_s27 = smov 0  }
   0x3 LB: > { %s2891_s28 = sadd.s32 4294967295, %s2825_s27   ;;  %s2068_s29 = sadd.s32 4294967294, %s2825_s27   ;;  %s2825_s27 = sphi %s2876_s27, %s4357_s27   ;;  %s2821_s26 = sphi %s2874_s26, %s4356_s26   ;;  %s2817_s25 = sphi %s2872_s25, %s4355_s25   ;;  %s2813_s24 = sphi %s2870_s24, %s4354_s24  }
   0x4   : > { %s2895_s30 = sadd.s32 1, %s2825_s27   ;;  %s179_s8 = sadd.s32 1, %s2821_s26 }
   0x5   : > { %s176_s9 = ssub.s32 %s2825_s27, %s2895_s30  ;;  %p189_p0 = scmp.ne.s32.totalorder %s2821_s26, %s2817_s25 }
   0x6   : > { %p177_p1 = scmp.eq.s32.totalorder %s176_s9, 0  ;;  %p190_p2 = scmp.eq.s32.totalorder %s2891_s28, 1 }
   0x7   : > { %p195_p3 = scmp.ne.s32.totalorder %s2817_s25, %s2813_s24  ;;  %p196_p4 = scmp.eq.s32.totalorder %s2068_s29, 1 }
   0x8   : > { %s2906_s10 = scalar_select %p177_p1, %s2821_s26, %s179_s8  }
   0x9   : > { %p2908_p5 = por %p190_p2, %p189_p0  ;;  %p2912_p6 = por %p196_p4, %p195_p3 }
   0xa   : > { %p2071_p7 = scmp.ge.s32.totalorder %s2825_s27, 1  ;;  %p241_p8 = scmp.lt.s32.totalorder %s2825_s27, 3 }
   0xc   : > { %p242_p9 = pnand %p2071_p7, %p241_p8 }
   0xe   : > { %245 = sbr.rel (%p242_p9) target bundleno = 1099 (0x44b), region = 48 }
  0x15   : > { %v312_v0 = vld [vmem:[%s4184_s1] sm:$0xf]  ;;  %vm417_vm0 = vcmask 1043456   ;;  %s2073_s15 = sshll.u32 %s2891_s28, 5  ;;  %v679_v2 = vld [vmem:[%s4186_s3 + $0x8] sm:$0xff]  ;;  %vm320_vm1 = vcmask 31744  }
  0x16   : > { %v678_v1 = vld [vmem:[%s4186_s3] sm:$0xff]  ;;  %2286 = vmatprep.subr.msk.mxu0 %vm417_vm0, %v312_v0  ;;  %p274_p10 = scmp.lt.s32.totalorder %s2073_s15, 63  ;;  %2464 = vmatprep.subr.msk.mxu1 %vm417_vm0, %v312_v0  ;;  %v680_v7 = vld [vmem:[%s4186_s3 + $0x10] sm:$0xff]  ;;  %v681_v8 = vld [vmem:[%s4186_s3 + $0x18] sm:$0xff]  ;;  %vm689_vm2 = vcmask 261120   ;;  %s270_s14 = sand.u32 1, %s2817_s25  }
  0x17   : > { %2287 = vmatpush3.msk.msra.mxu0 %vm417_vm0, %v312_v0  ;;  %2465 = vmatpush3.msk.msra.mxu1 %vm417_vm0, %v312_v0  ;;  %v2448_v3 = vpack.c.bf16 %v679_v2, %v678_v1  ;;  %v2452_v13 = vpack.c.bf16 %v681_v8, %v680_v7  ;;  %v1043_v39 = vld [vmem:[%s4188_s5] sm:$0xff]  ;;  %v1044_v40 = vld [vmem:[%s4188_s5 + $0x8] sm:$0xff]  ;;  %v1045_v41 = vld [vmem:[%s4188_s5 + $0x10] sm:$0xff]  ;;  %s2180_s17 = sshll.u32 %s2891_s28, 12  ;;  %s4142_s28 = scalar_lea.sflag [#allocation3], %s270_s14 }
  0x18   : > { %s4359_s15 = smov (!%p274_p10, %s2073_s15), 63  ;;  %v2456_v42 = vpack.c.bf16 %v1044_v40, %v1043_v39  ;;  %v1046_v43 = vld [vmem:[%s4188_s5 + $0x18] sm:$0xff]  ;;  %v3018_v45 = vld [vmem:[%s4185_s2] ss:$0 sm:$0xff]  ;;  %s4128_s21 = scalar_lea.hbm %s4190_s7, %s2180_s17 }
  0x19   : > { %2449 = vmatprep.subr.bf16.mxu1 %v2448_v3  ;;  %s2074_s20 = sshll.u32 %s4359_s15, 3  ;;  %v2460_v44 = vpack.c.bf16 %v1046_v43, %v1045_v41  ;;  %s2072_s15 = sshll.u32 %s270_s14, 8 }
  0x1a   : > { %s2931_s23 = scalar_lea.vmem %s4183_s0, %s2074_s20  ;;  %2457 = vmatprep.subr.bf16.mxu0 %v2456_v42  ;;  %s3764_s16 = scalar_lea.vmem [#allocation2], %s2072_s15 }
  0x1b   : > { %v280_v4 = vld [vmem:[%s2931_s23] sm:$0xff]  ;;  %v281_v5 = vld [vmem:[%s2931_s23 + $0x8] sm:$0xff]  ;;  %v282_v6 = vld [vmem:[%s2931_s23 + $0x10] sm:$0xff]  ;;  %s2006_s18 = sshll.u32 %s3764_s16, 4  ;;  %s4130_s18 = int_to_ptr.vmem [resolvable:$true] %s2006_s18 }
  0x1c   : > { %2288 = vmatprep.mubr.msk.f32.mxu0 %vm320_vm1, %v280_v4  ;;  %v283_v9 = vld [vmem:[%s2931_s23 + $0x18] sm:$0xff]  ;;  %v284_v10 = vld [vmem:[%s2931_s23 + $0x20] sm:$0xff]  ;;  %v297_v12 = vld [vmem:[%s2931_s23 + $0x88] sm:$0xff]  ;;  %s2763_s22 = scalar_lea.vmem %s4130_s18, 4096 }
  0x1d   : > { %2289 = vmatmul.mubr.msk.f32.vlgmr.msra.gmra.mrb[0].mxu0 %vm320_vm1, %v281_v5  ;;  %v296_v11 = vld [vmem:[%s2931_s23 + $0x80] sm:$0xff]  ;;  %v298_v14 = vld [vmem:[%s2931_s23 + $0x90] sm:$0xff]  ;;  %v285_v15 = vld [vmem:[%s2931_s23 + $0x28] sm:$0xff]  ;;  %p2764_p11 = scmp.ne.s32.totalorder %s4130_s18, %s2763_s22 }
  0x1e   : > { %2291 = vmatprep.mubr.msk.f32.mxu0 %vm320_vm1, %v282_v6  ;;  %2312 = vmatprep.mubr.msk.f32.mxu1 %vm320_vm1, %v296_v11  ;;  %v286_v16 = vld [vmem:[%s2931_s23 + $0x30] sm:$0xff]  ;;  %v299_v17 = vld [vmem:[%s2931_s23 + $0x98] sm:$0xff]  ;;  %v300_v18 = vld [vmem:[%s2931_s23 + $0xa0] sm:$0xff] }
  0x1f   : > { %2313 = vmatmul.mubr.msk.f32.vlgmr.msra.gmra.mrb[0].mxu1 %vm320_vm1, %v297_v12  ;;  %v287_v19 = vld [vmem:[%s2931_s23 + $0x38] sm:$0xff]  ;;  %v288_v20 = vld [vmem:[%s2931_s23 + $0x40] sm:$0xff]  ;;  %v301_v21 = vld [vmem:[%s2931_s23 + $0xa8] sm:$0xff]  ;;  %2459 = vmatpush3.bf16.msra.mxu0 %v2456_v42  ;;  %p2765_p12 = pnand %p2764_p11, %p2908_p5 }
  0x20   : > { %2315 = vmatprep.mubr.msk.f32.mxu1 %vm320_vm1, %v298_v14  ;;  %2451 = vmatpush3.bf16.msra.mxu1 %v2448_v3  ;;  %v302_v22 = vld [vmem:[%s2931_s23 + $0xb0] sm:$0xff]  ;;  %v289_v23 = vld [vmem:[%s2931_s23 + $0x48] sm:$0xff]  ;;  %v303_v25 = vld [vmem:[%s2931_s23 + $0xb8] sm:$0xff] }
  0x21   : > { %2292 = vmatmul.mubr.msk.f32.gmra.mrb[2].mxu0 %vm320_vm1, %v283_v9  ;;  %2453 = vmatprep.subr.bf16.mxu1 %v2452_v13  ;;  %v290_v24 = vld [vmem:[%s2931_s23 + $0x50] sm:$0xff]  ;;  %v304_v26 = vld [vmem:[%s2931_s23 + $0xc0] sm:$0xff]  ;;  %v291_v27 = vld [vmem:[%s2931_s23 + $0x58] sm:$0xff]  ;;  %p2766_p13 = pneg %p2765_p12 }
  0x22   : > { %2294 = vmatprep.mubr.msk.f32.mxu0 %vm320_vm1, %v284_v10  ;;  %v292_v28 = vld [vmem:[%s2931_s23 + $0x60] sm:$0xff]  ;;  %v305_v29 = vld [vmem:[%s2931_s23 + $0xc8] sm:$0xff]  ;;  %v306_v30 = vld [vmem:[%s2931_s23 + $0xd0] sm:$0xff]  ;;  %2461 = vmatprep.subr.bf16.mxu0 %v2460_v44 }
  0x23   : > { %2316 = vmatmul.mubr.msk.f32.gmra.mrb[2].mxu1 %vm320_vm1, %v299_v17  ;;  %v293_v31 = vld [vmem:[%s2931_s23 + $0x68] sm:$0xff]  ;;  %v294_v32 = vld [vmem:[%s2931_s23 + $0x70] sm:$0xff]  ;;  %v307_v33 = vld [vmem:[%s2931_s23 + $0xd8] sm:$0xff]  ;;  %2463 = vmatpush3.bf16.msra.mxu0 %v2460_v44 }
  0x24   : > { %2318 = vmatprep.mubr.msk.f32.mxu1 %vm320_vm1, %v300_v18  ;;  %2455 = vmatpush3.bf16.msra.mxu1 %v2452_v13  ;;  %v308_v34 = vld [vmem:[%s2931_s23 + $0xe0] sm:$0xff]  ;;  %v295_v35 = vld [vmem:[%s2931_s23 + $0x78] sm:$0xff]  ;;  %v309_v36 = vld [vmem:[%s2931_s23 + $0xe8] sm:$0xff] }
  0x25   : > { %2295 = vmatmul.mubr.msk.f32.gmra.mrb[4].mxu0 %vm320_vm1, %v285_v15  ;;  %v310_v37 = vld [vmem:[%s2931_s23 + $0xf0] sm:$0xff]  ;;  %v311_v38 = vld [vmem:[%s2931_s23 + $0xf8] sm:$0xff]  ;;  %s2827_s23 = smov [#allocation2]  }
  0x26   : > { %2297 = vmatprep.mubr.msk.f32.mxu0 %vm320_vm1, %v286_v16  ;;  %s2767_s29 = sshll.u32 %s2827_s23, 4  ;;  %s2768_s29 = int_to_ptr.vmem [resolvable:$false] %s2767_s29 }
  0x27   : > { %2319 = vmatmul.mubr.msk.f32.gmra.mrb[4].mxu1 %vm320_vm1, %v301_v21  ;;  %s2769_s8 = scalar_lea.vmem %s2768_s29, 8192  ;;  %p2770_p0 = scmp.lt.s32.totalorder %s4130_s18, %s2768_s29 }
  0x28   : > { %2321 = vmatprep.mubr.msk.f32.mxu1 %vm320_vm1, %v302_v22  ;;  %p2771_p1 = scmp.lt.s32.totalorder %s2769_s8, %s2763_s22 }
  0x29   : > { %2298 = vmatmul.mubr.msk.f32.gmra.mrb[6].mxu0 %vm320_vm1, %v287_v19 }
  0x2a   : > { %2300 = vmatprep.mubr.msk.f32.mxu0 %vm320_vm1, %v288_v20  ;;  %p2772_p2 = por %p2771_p1, %p2770_p0 }
  0x2b   : > { %2322 = vmatmul.mubr.msk.f32.gmra.mrb[6].mxu1 %vm320_vm1, %v303_v25 }
  0x2c   : > { %2324 = vmatprep.mubr.msk.f32.mxu1 %vm320_vm1, %v304_v26  ;;  %p2773_p3 = pnand %p2772_p2, %p2766_p13 }
  0x2d   : > { %2301 = vmatmul.mubr.msk.f32.gmra.mrb[8].mxu0 %vm320_vm1, %v289_v23 }
  0x2e   : > { %2303 = vmatprep.mubr.msk.f32.mxu0 %vm320_vm1, %v290_v24 }
  0x2f   : > { %2325 = vmatmul.mubr.msk.f32.gmra.mrb[8].mxu1 %vm320_vm1, %v305_v29 }
  0x30   : > { %2327 = vmatprep.mubr.msk.f32.mxu1 %vm320_vm1, %v306_v30 }
  0x31   : > { %2304 = vmatmul.mubr.msk.f32.gmra.mrb[10].mxu0 %vm320_vm1, %v291_v27 }
  0x32   : > { %2306 = vmatprep.mubr.msk.f32.mxu0 %vm320_vm1, %v292_v28 }
  0x33   : > { %2328 = vmatmul.mubr.msk.f32.gmra.mrb[10].mxu1 %vm320_vm1, %v307_v33 }
  0x34   : > { %2330 = vmatprep.mubr.msk.f32.mxu1 %vm320_vm1, %v308_v34 }
  0x35   : > { %2307 = vmatmul.mubr.msk.f32.gmra.mrb[12].mxu0 %vm320_vm1, %v293_v31 }
  0x36   : > { %2309 = vmatprep.mubr.msk.f32.mxu0 %vm320_vm1, %v294_v32 }
  0x37   : > { %2331 = vmatmul.mubr.msk.f32.gmra.mrb[12].mxu1 %vm320_vm1, %v309_v36 }
  0x38   : > { %2333 = vmatprep.mubr.msk.f32.mxu1 %vm320_vm1, %v310_v37 }
  0x39   : > { %2310 = vmatmul.mubr.msk.f32.gmra.mrb[14].mxu0 %vm320_vm1, %v295_v35 }
  0x3b   : > { %2334 = vmatmul.mubr.msk.f32.gmra.mrb[14].mxu1 %vm320_vm1, %v311_v38 }
  0xf0   : > { %v2290_v46 = vpop.f32.mrb[0].mxu0 }
  0xf1   : > { %v493_v47 = vadd.f32 %v2290_v46, %v3018_v45  ;;  %v487_v48 = vpop.f32.mrb[1].mxu0 }
  0xf2   : > { %v488_v49 = vadd.f32 %v3018_v45, %v487_v48  ;;  %v3023_v53 = vpop.f32.mrb[0].mxu1 }
  0xf3   : > { %v567_v55 = vpop.f32.mrb[1].mxu1  ;;  %v573_v39 = vadd.f32 %v3023_v53, %v3018_v45 }
  0xf4   : > { %2507 = vtanh.f32 %v488_v49  ;;  %v2293_v50 = vpop.f32.mrb[2].mxu0  ;;  %v568_v29 = vadd.f32 %v3018_v45, %v567_v55 }
  0xf5   : > { %2509 = vtanh.f32 %v493_v47  ;;  %v503_v51 = vadd.f32 %v2293_v50, %v3018_v45  ;;  %v497_v52 = vpop.f32.mrb[3].mxu0 }
  0xf6   : > { %v498_v54 = vadd.f32 %v3018_v45, %v497_v52  ;;  %v3027_v59 = vpop.f32.mrb[2].mxu1 }
  0xf7   : > { %v3030_v61 = vpop.f32.mrb[3].mxu1  ;;  %v583_v46 = vadd.f32 %v3027_v59, %v3018_v45 }
  0xf8   : > { %2511 = vtanh.f32 %v498_v54  ;;  %v2296_v56 = vpop.f32.mrb[4].mxu0  ;;  %v578_v40 = vadd.f32 %v3018_v45, %v3030_v61 }
  0xf9   : > { %2513 = vtanh.f32 %v503_v51  ;;  %v513_v57 = vadd.f32 %v2296_v56, %v3018_v45  ;;  %v507_v58 = vpop.f32.mrb[5].mxu0 }
  0xfa   : > { %v508_v60 = vadd.f32 %v3018_v45, %v507_v58  ;;  %v3033_v1 = vpop.f32.mrb[4].mxu1 }
  0xfb   : > { %2515 = vtanh.f32 %v513_v57  ;;  %v3036_v4 = vpop.f32.mrb[5].mxu1  ;;  %v593_v50 = vadd.f32 %v3033_v1, %v3018_v45 }
  0xfc   : > { %2517 = vtanh.f32 %v508_v60  ;;  %v2299_v62 = vpop.f32.mrb[6].mxu0  ;;  %v588_v47 = vadd.f32 %v3018_v45, %v3036_v4 }
  0xfd   : > { %v523_v63 = vadd.f32 %v2299_v62, %v3018_v45  ;;  %v517_v0 = vpop.f32.mrb[7].mxu0 }
  0xfe   : > { %v2508_v2 = vpop.eup %2507  ;;  %v518_v3 = vadd.f32 %v3018_v45, %v517_v0  ;;  %v3041_v9 = vpop.f32.mrb[6].mxu1 }
  0xff   : > { %v2510_v5 = vpop.eup %2509  ;;  %2519 = vtanh.f32 %v523_v63  ;;  %2344 = vmatprep.mubr.msk.f32.mxu1 %vm689_vm2, %v2508_v2  ;;  %v3044_v12 = vpop.f32.mrb[7].mxu1  ;;  %v603_v55 = vadd.f32 %v3041_v9, %v3018_v45 }
 0x100   : > { %2521 = vtanh.f32 %v518_v3  ;;  %v2302_v6 = vpop.f32.mrb[8].mxu0  ;;  %2345 = vmatmul.mubr.msk.f32.vlgmr.msra.gmra.mrb[16].mxu1 %vm689_vm2, %v2510_v5  ;;  %v598_v52 = vadd.f32 %v3018_v45, %v3044_v12 }
 0x101   : > { %v533_v7 = vadd.f32 %v2302_v6, %v3018_v45  ;;  %v527_v8 = vpop.f32.mrb[9].mxu0 }
 0x102   : > { %v2512_v10 = vpop.eup %2511  ;;  %v528_v11 = vadd.f32 %v3018_v45, %v527_v8  ;;  %v3049_v18 = vpop.f32.mrb[8].mxu1 }
 0x103   : > { %v2514_v13 = vpop.eup %2513  ;;  %2523 = vtanh.f32 %v533_v7  ;;  %2347 = vmatprep.mubr.msk.f32.mxu1 %vm689_vm2, %v2512_v10  ;;  %v607_v21 = vpop.f32.mrb[9].mxu1  ;;  %v613_v59 = vadd.f32 %v3049_v18, %v3018_v45 }
 0x104   : > { %2525 = vtanh.f32 %v528_v11  ;;  %v2305_v14 = vpop.f32.mrb[10].mxu0  ;;  %2348 = vmatmul.mubr.msk.f32.gmra.mrb[18].mxu1 %vm689_vm2, %v2514_v13  ;;  %v608_v56 = vadd.f32 %v3018_v45, %v607_v21 }
 0x105   : > { %v2516_v15 = vpop.eup %2515  ;;  %v543_v16 = vadd.f32 %v2305_v14, %v3018_v45  ;;  %v537_v17 = vpop.f32.mrb[11].mxu0  ;;  %v3114_v14 = vld [vmem:[%s4187_s4] ss:$0 sm:$0xff] }
 0x106   : > { %v2518_v19 = vpop.eup %2517  ;;  %v538_v20 = vadd.f32 %v3018_v45, %v537_v17  ;;  %v3055_v26 = vpop.f32.mrb[10].mxu1 }
 0x107   : > { %2527 = vtanh.f32 %v543_v16  ;;  %2350 = vmatprep.mubr.msk.f32.mxu1 %vm689_vm2, %v2518_v19  ;;  %v617_v30 = vpop.f32.mrb[11].mxu1  ;;  %v623_v63 = vadd.f32 %v3055_v26, %v3018_v45 }
 0x108   : > { %2529 = vtanh.f32 %v538_v20  ;;  %v2308_v22 = vpop.f32.mrb[12].mxu0  ;;  %2351 = vmatmul.mubr.msk.f32.gmra.mrb[20].mxu1 %vm689_vm2, %v2516_v15  ;;  %v618_v60 = vadd.f32 %v3018_v45, %v617_v30 }
 0x109   : > { %v2520_v23 = vpop.eup %2519  ;;  %v553_v24 = vadd.f32 %v2308_v22, %v3018_v45  ;;  %v547_v25 = vpop.f32.mrb[13].mxu0 }
 0x10a   : > { %v2522_v27 = vpop.eup %2521  ;;  %v548_v28 = vadd.f32 %v3018_v45, %v547_v25  ;;  %v2332_v35 = vpop.f32.mrb[12].mxu1 }
 0x10b   : > { %2531 = vtanh.f32 %v553_v24  ;;  %2353 = vmatprep.mubr.msk.f32.mxu1 %vm689_vm2, %v2522_v27  ;;  %v627_v38 = vpop.f32.mrb[13].mxu1  ;;  %v633_v3 = vadd.f32 %v2332_v35, %v3018_v45 }
 0x10c   : > { %2533 = vtanh.f32 %v548_v28  ;;  %v2311_v31 = vpop.f32.mrb[14].mxu0  ;;  %2354 = vmatmul.mubr.msk.f32.gmra.mrb[22].mxu1 %vm689_vm2, %v2520_v23  ;;  %v628_v0 = vadd.f32 %v3018_v45, %v627_v38 }
 0x10d   : > { %v2524_v32 = vpop.eup %2523  ;;  %v563_v33 = vadd.f32 %v2311_v31, %v3018_v45  ;;  %v557_v34 = vpop.f32.mrb[15].mxu0  ;;  %2535 = vtanh.f32 %v568_v29 }
 0x10e   : > { %v2526_v36 = vpop.eup %2525  ;;  %v558_v37 = vadd.f32 %v3018_v45, %v557_v34  ;;  %v2335_v42 = vpop.f32.mrb[14].mxu1 }
 0x10f   : > { %2537 = vtanh.f32 %v563_v33  ;;  %2356 = vmatprep.mubr.msk.f32.mxu1 %vm689_vm2, %v2526_v36  ;;  %v637_v44 = vpop.f32.mrb[15].mxu1  ;;  %v643_v7 = vadd.f32 %v2335_v42, %v3018_v45 }
 0x110   : > { %2539 = vtanh.f32 %v558_v37  ;;  %2357 = vmatmul.mubr.msk.f32.gmra.mrb[24].mxu1 %vm689_vm2, %v2524_v32  ;;  %v638_v4 = vadd.f32 %v3018_v45, %v637_v44 }
 0x111   : > { %v2528_v41 = vpop.eup %2527  ;;  %2541 = vtanh.f32 %v573_v39 }
 0x112   : > { %v2530_v43 = vpop.eup %2529  ;;  %2543 = vtanh.f32 %v578_v40 }
 0x113   : > { %2359 = vmatprep.mubr.msk.f32.mxu1 %vm689_vm2, %v2530_v43  ;;  %2545 = vtanh.f32 %v583_v46 }
 0x114   : > { %2360 = vmatmul.mubr.msk.f32.gmra.mrb[26].mxu1 %vm689_vm2, %v2528_v41  ;;  %2547 = vtanh.f32 %v588_v47 }
 0x115   : > { %v2532_v48 = vpop.eup %2531  ;;  %2549 = vtanh.f32 %v593_v50 }
 0x116   : > { %v2534_v49 = vpop.eup %2533  ;;  %2551 = vtanh.f32 %v598_v52 }
 0x117   : > { %2362 = vmatprep.mubr.msk.f32.mxu1 %vm689_vm2, %v2534_v49  ;;  %v2536_v51 = vpop.eup %2535  ;;  %2553 = vtanh.f32 %v603_v55 }
 0x118   : > { %2363 = vmatmul.mubr.msk.f32.gmra.mrb[28].mxu1 %vm689_vm2, %v2532_v48  ;;  %2555 = vtanh.f32 %v608_v56 }
 0x119   : > { %v2538_v53 = vpop.eup %2537  ;;  %2557 = vtanh.f32 %v613_v59 }
 0x11a   : > { %v2540_v54 = vpop.eup %2539  ;;  %2559 = vtanh.f32 %v618_v60 }
 0x11b   : > { %2365 = vmatprep.mubr.msk.f32.mxu1 %vm689_vm2, %v2540_v54  ;;  %v2542_v57 = vpop.eup %2541  ;;  %2561 = vtanh.f32 %v623_v63 }
 0x11c   : > { %2366 = vmatmul.mubr.msk.f32.gmra.mrb[30].mxu1 %vm689_vm2, %v2538_v53  ;;  %v2544_v58 = vpop.eup %2543  ;;  %2563 = vtanh.f32 %v628_v0 }
 0x11d   : > { %2368 = vmatprep.mubr.msk.f32.mxu1 %vm689_vm2, %v2536_v51  ;;  %v2546_v61 = vpop.eup %2545  ;;  %2565 = vtanh.f32 %v633_v3 }
 0x11e   : > { %v2548_v62 = vpop.eup %2547  ;;  %2567 = vtanh.f32 %v638_v4 }
 0x11f   : > { %v2550_v1 = vpop.eup %2549  ;;  %2569 = vtanh.f32 %v643_v7 }
 0x120   : > { %2369 = vmatmul.mubr.msk.f32.gmra.mrb[32].mxu1 %vm689_vm2, %v2542_v57  ;;  %v2552_v2 = vpop.eup %2551 }
 0x121   : > { %2371 = vmatprep.mubr.msk.f32.mxu1 %vm689_vm2, %v2544_v58  ;;  %v2554_v5 = vpop.eup %2553 }
 0x122   : > { %v2556_v6 = vpop.eup %2555 }
 0x123   : > { %v2558_v8 = vpop.eup %2557 }
 0x124   : > { %2372 = vmatmul.mubr.msk.f32.gmra.mrb[34].mxu1 %vm689_vm2, %v2546_v61  ;;  %v2560_v9 = vpop.eup %2559 }
 0x125   : > { %2374 = vmatprep.mubr.msk.f32.mxu1 %vm689_vm2, %v2548_v62  ;;  %v2562_v10 = vpop.eup %2561 }
 0x126   : > { %v2564_v11 = vpop.eup %2563 }
 0x127   : > { %v2566_v12 = vpop.eup %2565 }
 0x128   : > { %2375 = vmatmul.mubr.msk.f32.gmra.mrb[36].mxu1 %vm689_vm2, %v2550_v1  ;;  %v2568_v45 = vpop.eup %2567 }
 0x129   : > { %2377 = vmatprep.mubr.msk.f32.mxu1 %vm689_vm2, %v2552_v2  ;;  %v2570_v13 = vpop.eup %2569 }
 0x12c   : > { %2378 = vmatmul.mubr.msk.f32.gmra.mrb[38].mxu1 %vm689_vm2, %v2554_v5 }
 0x12d   : > { %2380 = vmatprep.mubr.msk.f32.mxu1 %vm689_vm2, %v2556_v6 }
 0x130   : > { %2381 = vmatmul.mubr.msk.f32.gmra.mrb[40].mxu1 %vm689_vm2, %v2558_v8 }
 0x131   : > { %2383 = vmatprep.mubr.msk.f32.mxu1 %vm689_vm2, %v2560_v9 }
 0x134   : > { %2384 = vmatmul.mubr.msk.f32.gmra.mrb[42].mxu1 %vm689_vm2, %v2562_v10 }
 0x135   : > { %2386 = vmatprep.mubr.msk.f32.mxu1 %vm689_vm2, %v2564_v11 }
 0x138   : > { %2387 = vmatmul.mubr.msk.f32.gmra.mrb[44].mxu1 %vm689_vm2, %v2566_v12 }
 0x139   : > { %2389 = vmatprep.mubr.msk.f32.mxu1 %vm689_vm2, %v2568_v45 }
 0x13c   : > { %2390 = vmatmul.mubr.msk.f32.gmra.mrb[46].mxu1 %vm689_vm2, %v2570_v13 }
 0x1d3   : > { %v2346_v15 = vpop.f32.mrb[16].mxu1 }
 0x1d4   : > { %v858_v16 = vadd.f32 %v2346_v15, %v3114_v14  ;;  %v852_v17 = vpop.f32.mrb[17].mxu1 }
 0x1d5   : > { %v853_v18 = vadd.f32 %v3114_v14, %v852_v17 }
 0x1d7   : > { %2571 = vtanh.f32 %v853_v18  ;;  %v2349_v19 = vpop.f32.mrb[18].mxu1 }
 0x1d8   : > { %2573 = vtanh.f32 %v858_v16  ;;  %v868_v20 = vadd.f32 %v2349_v19, %v3114_v14  ;;  %v862_v21 = vpop.f32.mrb[19].mxu1 }
 0x1d9   : > { %v863_v22 = vadd.f32 %v3114_v14, %v862_v21 }
 0x1db   : > { %2575 = vtanh.f32 %v863_v22  ;;  %v2352_v23 = vpop.f32.mrb[20].mxu1 }
 0x1dc   : > { %2577 = vtanh.f32 %v868_v20  ;;  %v878_v24 = vadd.f32 %v2352_v23, %v3114_v14  ;;  %v872_v25 = vpop.f32.mrb[21].mxu1 }
 0x1dd   : > { %v873_v26 = vadd.f32 %v3114_v14, %v872_v25 }
 0x1de   : > { %2579 = vtanh.f32 %v878_v24 }
 0x1df   : > { %2581 = vtanh.f32 %v873_v26  ;;  %v2355_v27 = vpop.f32.mrb[22].mxu1 }
 0x1e0   : > { %v888_v28 = vadd.f32 %v2355_v27, %v3114_v14  ;;  %v882_v29 = vpop.f32.mrb[23].mxu1 }
 0x1e1   : > { %v2572_v30 = vpop.eup %2571  ;;  %v883_v31 = vadd.f32 %v3114_v14, %v882_v29 }
 0x1e2   : > { %v2574_v32 = vpop.eup %2573  ;;  %2583 = vtanh.f32 %v888_v28  ;;  %2400 = vmatprep.mubr.msk.f32.mxu0 %vm689_vm2, %v2572_v30 }
 0x1e3   : > { %2585 = vtanh.f32 %v883_v31  ;;  %v2358_v33 = vpop.f32.mrb[24].mxu1  ;;  %2401 = vmatmul.mubr.msk.f32.vlgmr.msra.gmra.mrb[16].mxu0 %vm689_vm2, %v2574_v32 }
 0x1e4   : > { %v898_v34 = vadd.f32 %v2358_v33, %v3114_v14  ;;  %v892_v35 = vpop.f32.mrb[25].mxu1 }
 0x1e5   : > { %v2576_v36 = vpop.eup %2575  ;;  %v893_v37 = vadd.f32 %v3114_v14, %v892_v35 }
 0x1e6   : > { %v2578_v38 = vpop.eup %2577  ;;  %2587 = vtanh.f32 %v898_v34  ;;  %2403 = vmatprep.mubr.msk.f32.mxu0 %vm689_vm2, %v2576_v36 }
 0x1e7   : > { %2589 = vtanh.f32 %v893_v37  ;;  %v2361_v39 = vpop.f32.mrb[26].mxu1  ;;  %2404 = vmatmul.mubr.msk.f32.gmra.mrb[18].mxu0 %vm689_vm2, %v2578_v38 }
 0x1e8   : > { %v2580_v40 = vpop.eup %2579  ;;  %v908_v41 = vadd.f32 %v2361_v39, %v3114_v14  ;;  %v902_v42 = vpop.f32.mrb[27].mxu1 }
 0x1e9   : > { %v2582_v43 = vpop.eup %2581  ;;  %v903_v44 = vadd.f32 %v3114_v14, %v902_v42 }
 0x1ea   : > { %2591 = vtanh.f32 %v908_v41  ;;  %2406 = vmatprep.mubr.msk.f32.mxu0 %vm689_vm2, %v2582_v43 }
 0x1eb   : > { %2593 = vtanh.f32 %v903_v44  ;;  %v2364_v46 = vpop.f32.mrb[28].mxu1  ;;  %2407 = vmatmul.mubr.msk.f32.gmra.mrb[20].mxu0 %vm689_vm2, %v2580_v40 }
 0x1ec   : > { %v2584_v47 = vpop.eup %2583  ;;  %v918_v48 = vadd.f32 %v2364_v46, %v3114_v14  ;;  %v912_v49 = vpop.f32.mrb[29].mxu1 }
 0x1ed   : > { %v2586_v50 = vpop.eup %2585  ;;  %v913_v51 = vadd.f32 %v3114_v14, %v912_v49 }
 0x1ee   : > { %2595 = vtanh.f32 %v918_v48  ;;  %2409 = vmatprep.mubr.msk.f32.mxu0 %vm689_vm2, %v2586_v50  ;;  %v1375_v48 = vlaneseq  ;;  %v3185_v50 = vld [vmem:[%s4189_s6] ss:$0 sm:$0xff] }
 0x1ef   : > { %2597 = vtanh.f32 %v913_v51  ;;  %v2367_v52 = vpop.f32.mrb[30].mxu1  ;;  %2410 = vmatmul.mubr.msk.f32.gmra.mrb[22].mxu0 %vm689_vm2, %v2584_v47 }
 0x1f0   : > { %v2588_v53 = vpop.eup %2587  ;;  %v928_v54 = vadd.f32 %v2367_v52, %v3114_v14  ;;  %v922_v55 = vpop.f32.mrb[31].mxu1  ;;  %v3180_v49 = vand.u32 127, %v1375_v48 }
 0x1f1   : > { %v2590_v56 = vpop.eup %2589  ;;  %v923_v57 = vadd.f32 %v3114_v14, %v922_v55 }
 0x1f2   : > { %2599 = vtanh.f32 %v928_v54  ;;  %2412 = vmatprep.mubr.msk.f32.mxu0 %vm689_vm2, %v2590_v56  ;;  %vm1377_vm3 = vcmp.lt.s32.totalorder %v3180_v49, 5  ;;  %vm1381_vm4 = vcmp.ge.s32.totalorder %v3180_v49, 10  ;;  %vm1382_vm5 = vcmp.lt.s32.totalorder %v3180_v49, 15 }
 0x1f3   : > { %2601 = vtanh.f32 %v923_v57  ;;  %v2370_v58 = vpop.f32.mrb[32].mxu1  ;;  %2413 = vmatmul.mubr.msk.f32.gmra.mrb[24].mxu0 %vm689_vm2, %v2588_v53  ;;  %vm1378_vm6 = vcmp.ge.s32.totalorder %v3180_v49, 5  ;;  %vm1379_vm7 = vcmp.lt.s32.totalorder %v3180_v49, 10  ;;  %vm3708_vm8 = vmand %vm1381_vm4, %vm1382_vm5 }
 0x1f4   : > { %v2592_v59 = vpop.eup %2591  ;;  %v938_v60 = vadd.f32 %v2370_v58, %v3114_v14  ;;  %v932_v61 = vpop.f32.mrb[33].mxu1  ;;  %vm3720_vm9 = vmand %vm1378_vm6, %vm1379_vm7 }
 0x1f5   : > { %v2594_v62 = vpop.eup %2593  ;;  %v933_v63 = vadd.f32 %v3114_v14, %v932_v61 }
 0x1f6   : > { %2603 = vtanh.f32 %v938_v60  ;;  %2415 = vmatprep.mubr.msk.f32.mxu0 %vm689_vm2, %v2594_v62 }
 0x1f7   : > { %2605 = vtanh.f32 %v933_v63  ;;  %v2373_v0 = vpop.f32.mrb[34].mxu1  ;;  %2416 = vmatmul.mubr.msk.f32.gmra.mrb[26].mxu0 %vm689_vm2, %v2592_v59 }
 0x1f8   : > { %v2596_v1 = vpop.eup %2595  ;;  %v948_v2 = vadd.f32 %v2373_v0, %v3114_v14  ;;  %v942_v3 = vpop.f32.mrb[35].mxu1 }
 0x1f9   : > { %v2598_v4 = vpop.eup %2597  ;;  %v943_v5 = vadd.f32 %v3114_v14, %v942_v3 }
 0x1fa   : > { %2607 = vtanh.f32 %v948_v2  ;;  %2418 = vmatprep.mubr.msk.f32.mxu0 %vm689_vm2, %v2598_v4 }
 0x1fb   : > { %2609 = vtanh.f32 %v943_v5  ;;  %v2376_v6 = vpop.f32.mrb[36].mxu1  ;;  %2419 = vmatmul.mubr.msk.f32.gmra.mrb[28].mxu0 %vm689_vm2, %v2596_v1 }
 0x1fc   : > { %v2600_v7 = vpop.eup %2599  ;;  %v958_v8 = vadd.f32 %v2376_v6, %v3114_v14  ;;  %v952_v9 = vpop.f32.mrb[37].mxu1 }
 0x1fd   : > { %v2602_v10 = vpop.eup %2601  ;;  %v953_v11 = vadd.f32 %v3114_v14, %v952_v9 }
 0x1fe   : > { %2611 = vtanh.f32 %v958_v8  ;;  %2421 = vmatprep.mubr.msk.f32.mxu0 %vm689_vm2, %v2602_v10 }
 0x1ff   : > { %2613 = vtanh.f32 %v953_v11  ;;  %v2379_v12 = vpop.f32.mrb[38].mxu1  ;;  %2422 = vmatmul.mubr.msk.f32.gmra.mrb[30].mxu0 %vm689_vm2, %v2600_v7 }
 0x200   : > { %v2604_v45 = vpop.eup %2603  ;;  %v968_v13 = vadd.f32 %v2379_v12, %v3114_v14  ;;  %v962_v15 = vpop.f32.mrb[39].mxu1 }
 0x201   : > { %v2606_v16 = vpop.eup %2605  ;;  %v963_v17 = vadd.f32 %v3114_v14, %v962_v15 }
 0x202   : > { %2615 = vtanh.f32 %v968_v13  ;;  %2424 = vmatprep.mubr.msk.f32.mxu0 %vm689_vm2, %v2606_v16 }
 0x203   : > { %2617 = vtanh.f32 %v963_v17  ;;  %v2382_v18 = vpop.f32.mrb[40].mxu1  ;;  %2425 = vmatmul.mubr.msk.f32.gmra.mrb[32].mxu0 %vm689_vm2, %v2604_v45 }
 0x204   : > { %v2608_v19 = vpop.eup %2607  ;;  %v978_v20 = vadd.f32 %v2382_v18, %v3114_v14  ;;  %v972_v21 = vpop.f32.mrb[41].mxu1 }
 0x205   : > { %v2610_v22 = vpop.eup %2609  ;;  %v973_v23 = vadd.f32 %v3114_v14, %v972_v21 }
 0x206   : > { %2619 = vtanh.f32 %v978_v20  ;;  %2427 = vmatprep.mubr.msk.f32.mxu0 %vm689_vm2, %v2610_v22 }
 0x207   : > { %2621 = vtanh.f32 %v973_v23  ;;  %v2385_v24 = vpop.f32.mrb[42].mxu1  ;;  %2428 = vmatmul.mubr.msk.f32.gmra.mrb[34].mxu0 %vm689_vm2, %v2608_v19 }
 0x208   : > { %v2612_v25 = vpop.eup %2611  ;;  %v988_v26 = vadd.f32 %v2385_v24, %v3114_v14  ;;  %v982_v27 = vpop.f32.mrb[43].mxu1 }
 0x209   : > { %v2614_v28 = vpop.eup %2613  ;;  %v983_v29 = vadd.f32 %v3114_v14, %v982_v27 }
 0x20a   : > { %2623 = vtanh.f32 %v988_v26  ;;  %2430 = vmatprep.mubr.msk.f32.mxu0 %vm689_vm2, %v2614_v28 }
 0x20b   : > { %2625 = vtanh.f32 %v983_v29  ;;  %v2388_v30 = vpop.f32.mrb[44].mxu1  ;;  %2431 = vmatmul.mubr.msk.f32.gmra.mrb[36].mxu0 %vm689_vm2, %v2612_v25 }
 0x20c   : > { %v2616_v31 = vpop.eup %2615  ;;  %v998_v32 = vadd.f32 %v2388_v30, %v3114_v14  ;;  %v992_v33 = vpop.f32.mrb[45].mxu1 }
 0x20d   : > { %v2618_v34 = vpop.eup %2617  ;;  %v993_v35 = vadd.f32 %v3114_v14, %v992_v33 }
 0x20e   : > { %2627 = vtanh.f32 %v998_v32  ;;  %2433 = vmatprep.mubr.msk.f32.mxu0 %vm689_vm2, %v2618_v34 }
 0x20f   : > { %2629 = vtanh.f32 %v993_v35  ;;  %v2391_v36 = vpop.f32.mrb[46].mxu1  ;;  %2434 = vmatmul.mubr.msk.f32.gmra.mrb[38].mxu0 %vm689_vm2, %v2616_v31 }
 0x210   : > { %v2620_v37 = vpop.eup %2619  ;;  %v1008_v38 = vadd.f32 %v2391_v36, %v3114_v14  ;;  %v1002_v39 = vpop.f32.mrb[47].mxu1 }
 0x211   : > { %v2622_v40 = vpop.eup %2621  ;;  %v1003_v41 = vadd.f32 %v3114_v14, %v1002_v39 }
 0x212   : > { %2631 = vtanh.f32 %v1008_v38  ;;  %2436 = vmatprep.mubr.msk.f32.mxu0 %vm689_vm2, %v2622_v40 }
 0x213   : > { %2633 = vtanh.f32 %v1003_v41  ;;  %2437 = vmatmul.mubr.msk.f32.gmra.mrb[40].mxu0 %vm689_vm2, %v2620_v37 }
 0x214   : > { %v2624_v42 = vpop.eup %2623 }
 0x215   : > { %v2626_v43 = vpop.eup %2625 }
 0x216   : > { %2439 = vmatprep.mubr.msk.f32.mxu0 %vm689_vm2, %v2626_v43 }
 0x217   : > { %2440 = vmatmul.mubr.msk.f32.gmra.mrb[42].mxu0 %vm689_vm2, %v2624_v42 }
 0x218   : > { %v2628_v44 = vpop.eup %2627 }
 0x219   : > { %v2630_v46 = vpop.eup %2629 }
 0x21a   : > { %2442 = vmatprep.mubr.msk.f32.mxu0 %vm689_vm2, %v2630_v46 }
 0x21b   : > { %2443 = vmatmul.mubr.msk.f32.gmra.mrb[44].mxu0 %vm689_vm2, %v2628_v44 }
 0x21c   : > { %v2632_v47 = vpop.eup %2631 }
 0x21d   : > { %v2634_v14 = vpop.eup %2633 }
 0x21e   : > { %2445 = vmatprep.mubr.msk.f32.mxu0 %vm689_vm2, %v2634_v14 }
 0x21f   : > { %2446 = vmatmul.mubr.msk.f32.gmra.mrb[46].mxu0 %vm689_vm2, %v2632_v47 }
 0x2b6   : > { %v2402_v51 = vpop.f32.mrb[16].mxu0 }
 0x2b7   : > { %v3189_v52 = vadd.f32 %v2402_v51, %v3185_v50  ;;  %v1216_v53 = vpop.f32.mrb[17].mxu0 }
 0x2b8   : > { %v3192_v54 = vadd.f32 %v3185_v50, %v1216_v53 }
 0x2b9   : > { %v1385_v55 = vsel %vm1377_vm3, %v3189_v52, -1e+30 }
 0x2ba   : > { %1418 = vmax.xlane.f32.xlu0 %v1385_v55  ;;  %v2405_v56 = vpop.f32.mrb[18].mxu0  ;;  %v1384_v61 = vsel %vm1377_vm3, %v3192_v54, -1e+30 }
 0x2bb   : > { %v3198_v57 = vadd.f32 %v2405_v56, %v3185_v50  ;;  %v1226_v58 = vpop.f32.mrb[19].mxu0 }
 0x2bc   : > { %v3201_v59 = vadd.f32 %v3185_v50, %v1226_v58 }
 0x2bd   : > { %v1387_v60 = vsel %vm1377_vm3, %v3198_v57, -1e+30 }
 0x2be   : > { %1422 = vmax.xlane.f32.xlu1 %v1387_v60  ;;  %v2408_v62 = vpop.f32.mrb[20].mxu0  ;;  %1416 = vmax.xlane.f32.xlu0 %v1384_v61  ;;  %v1386_v2 = vsel %vm1377_vm3, %v3201_v59, -1e+30 }
 0x2bf   : > { %v1236_v63 = vpop.f32.mrb[21].mxu0  ;;  %v3213_v1 = vadd.f32 %v2408_v62, %v3185_v50 }
 0x2c0   : > { %v3210_v0 = vadd.f32 %v3185_v50, %v1236_v63 }
 0x2c1   : > { %v1389_v8 = vsel %vm1377_vm3, %v3213_v1, -1e+30 }
 0x2c2   : > { %v2411_v3 = vpop.f32.mrb[22].mxu0  ;;  %1420 = vmax.xlane.f32.xlu1 %v1386_v2  ;;  %v1388_v4 = vsel %vm1377_vm3, %v3210_v0, -1e+30 }
 0x2c3   : > { %v1246_v5 = vpop.f32.mrb[23].mxu0  ;;  %1424 = vmax.xlane.f32.xlu0 %v1388_v4  ;;  %v3225_v7 = vadd.f32 %v2411_v3, %v3185_v50 }
 0x2c4   : > { %v3222_v6 = vadd.f32 %v3185_v50, %v1246_v5 }
 0x2c5   : > { %v1391_v13 = vsel %vm1377_vm3, %v3225_v7, -1e+30 }
 0x2c6   : > { %v2414_v9 = vpop.f32.mrb[24].mxu0  ;;  %1426 = vmax.xlane.f32.xlu1 %v1389_v8  ;;  %v1390_v10 = vsel %vm1377_vm3, %v3222_v6, -1e+30 }
 0x2c7   : > { %v1256_v11 = vpop.f32.mrb[25].mxu0  ;;  %1428 = vmax.xlane.f32.xlu0 %v1390_v10  ;;  %v3237_v45 = vadd.f32 %v2414_v9, %v3185_v50 }
 0x2c8   : > { %v3234_v12 = vadd.f32 %v3185_v50, %v1256_v11 }
 0x2c9   : > { %v1393_v20 = vsel %vm1377_vm3, %v3237_v45, -1e+30 }
 0x2ca   : > { %v2417_v15 = vpop.f32.mrb[26].mxu0  ;;  %1430 = vmax.xlane.f32.xlu1 %v1391_v13  ;;  %v1392_v16 = vsel %vm1377_vm3, %v3234_v12, -1e+30 }
 0x2cb   : > { %v1266_v17 = vpop.f32.mrb[27].mxu0  ;;  %1432 = vmax.xlane.f32.xlu0 %v1392_v16  ;;  %v3249_v19 = vadd.f32 %v2417_v15, %v3185_v50 }
 0x2cc   : > { %v3246_v18 = vadd.f32 %v3185_v50, %v1266_v17 }
 0x2cd   : > { %v1395_v26 = vsel %vm1377_vm3, %v3249_v19, -1e+30 }
 0x2ce   : > { %v2420_v21 = vpop.f32.mrb[28].mxu0  ;;  %1434 = vmax.xlane.f32.xlu1 %v1393_v20  ;;  %v1394_v22 = vsel %vm1377_vm3, %v3246_v18, -1e+30 }
 0x2cf   : > { %v1276_v23 = vpop.f32.mrb[29].mxu0  ;;  %1436 = vmax.xlane.f32.xlu0 %v1394_v22  ;;  %v3261_v25 = vadd.f32 %v2420_v21, %v3185_v50 }
 0x2d0   : > { %v3258_v24 = vadd.f32 %v3185_v50, %v1276_v23 }
 0x2d1   : > { %v1397_v32 = vsel %vm1377_vm3, %v3261_v25, -1e+30 }
 0x2d2   : > { %v2423_v27 = vpop.f32.mrb[30].mxu0  ;;  %1438 = vmax.xlane.f32.xlu1 %v1395_v26  ;;  %v1396_v28 = vsel %vm1377_vm3, %v3258_v24, -1e+30 }
 0x2d3   : > { %v1286_v29 = vpop.f32.mrb[31].mxu0  ;;  %1440 = vmax.xlane.f32.xlu0 %v1396_v28  ;;  %v3273_v31 = vadd.f32 %v2423_v27, %v3185_v50 }
 0x2d4   : > { %v3270_v30 = vadd.f32 %v3185_v50, %v1286_v29 }
 0x2d5   : > { %4245 = vst [vmem:[#allocation6_spill] sm:$0xff] %v3273_v31  ;;  %v1399_v38 = vsel %vm1377_vm3, %v3273_v31, -1e+30 }
 0x2d6   : > { %4244 = vst [vmem:[#allocation5_spill] sm:$0xff] %v3270_v30  ;;  %v2426_v33 = vpop.f32.mrb[32].mxu0  ;;  %1442 = vmax.xlane.f32.xlu1 %v1397_v32  ;;  %v1398_v34 = vsel %vm1377_vm3, %v3270_v30, -1e+30 }
 0x2d7   : > { %v1296_v35 = vpop.f32.mrb[33].mxu0  ;;  %1444 = vmax.xlane.f32.xlu0 %v1398_v34  ;;  %v3285_v37 = vadd.f32 %v2426_v33, %v3185_v50 }
 0x2d8   : > { %v3282_v36 = vadd.f32 %v3185_v50, %v1296_v35 }
 0x2d9   : > { %4247 = vst [vmem:[#allocation8_spill] sm:$0xff] %v3285_v37  ;;  %v1401_v44 = vsel %vm1377_vm3, %v3285_v37, -1e+30 }
 0x2da   : > { %4246 = vst [vmem:[#allocation7_spill] sm:$0xff] %v3282_v36  ;;  %v2429_v39 = vpop.f32.mrb[34].mxu0  ;;  %1446 = vmax.xlane.f32.xlu1 %v1399_v38  ;;  %v1400_v40 = vsel %vm1377_vm3, %v3282_v36, -1e+30 }
 0x2db   : > { %v1306_v41 = vpop.f32.mrb[35].mxu0  ;;  %1448 = vmax.xlane.f32.xlu0 %v1400_v40  ;;  %v3297_v43 = vadd.f32 %v2429_v39, %v3185_v50 }
 0x2dc   : > { %v3294_v42 = vadd.f32 %v3185_v50, %v1306_v41 }
 0x2dd   : > { %4249 = vst [vmem:[#allocation10_spill] sm:$0xff] %v3297_v43  ;;  %v1403_v53 = vsel %vm1377_vm3, %v3297_v43, -1e+30 }
 0x2de   : > { %4248 = vst [vmem:[#allocation9_spill] sm:$0xff] %v3294_v42  ;;  %v2432_v46 = vpop.f32.mrb[36].mxu0  ;;  %1450 = vmax.xlane.f32.xlu1 %v1401_v44  ;;  %v1402_v47 = vsel %vm1377_vm3, %v3294_v42, -1e+30 }
 0x2df   : > { %v1316_v14 = vpop.f32.mrb[37].mxu0  ;;  %1452 = vmax.xlane.f32.xlu0 %v1402_v47  ;;  %v3309_v51 = vadd.f32 %v2432_v46, %v3185_v50 }
 0x2e0   : > { %v3306_v48 = vadd.f32 %v3185_v50, %v1316_v14 }
 0x2e1   : > { %4251 = vst [vmem:[#allocation12_spill] sm:$0xff] %v3309_v51  ;;  %v1405_v62 = vsel %vm1377_vm3, %v3309_v51, -1e+30 }
 0x2e2   : > { %4250 = vst [vmem:[#allocation11_spill] sm:$0xff] %v3306_v48  ;;  %v2435_v55 = vpop.f32.mrb[38].mxu0  ;;  %1454 = vmax.xlane.f32.xlu1 %v1403_v53  ;;  %v1404_v56 = vsel %vm1377_vm3, %v3306_v48, -1e+30 }
 0x2e3   : > { %v1326_v58 = vpop.f32.mrb[39].mxu0  ;;  %1456 = vmax.xlane.f32.xlu0 %v1404_v56  ;;  %v3321_v61 = vadd.f32 %v2435_v55, %v3185_v50 }
 0x2e4   : > { %v3318_v60 = vadd.f32 %v3185_v50, %v1326_v58 }
 0x2e5   : > { %4253 = vst [vmem:[#allocation14_spill] sm:$0xff] %v3321_v61  ;;  %v1407_v8 = vsel %vm1377_vm3, %v3321_v61, -1e+30 }
 0x2e6   : > { %4252 = vst [vmem:[#allocation13_spill] sm:$0xff] %v3318_v60  ;;  %v2438_v63 = vpop.f32.mrb[40].mxu0  ;;  %1458 = vmax.xlane.f32.xlu1 %v1405_v62  ;;  %v1406_v2 = vsel %vm1377_vm3, %v3318_v60, -1e+30 }
 0x2e7   : > { %v1336_v3 = vpop.f32.mrb[41].mxu0  ;;  %1460 = vmax.xlane.f32.xlu0 %v1406_v2  ;;  %v3333_v5 = vadd.f32 %v2438_v63, %v3185_v50 }
 0x2e8   : > { %v3330_v4 = vadd.f32 %v3185_v50, %v1336_v3 }
 0x2e9   : > { %4255 = vst [vmem:[#allocation16_spill] sm:$0xff] %v3333_v5  ;;  %v1409_v16 = vsel %vm1377_vm3, %v3333_v5, -1e+30 }
 0x2ea   : > { %4254 = vst [vmem:[#allocation15_spill] sm:$0xff] %v3330_v4  ;;  %v2441_v9 = vpop.f32.mrb[42].mxu0  ;;  %1462 = vmax.xlane.f32.xlu1 %v1407_v8  ;;  %v1408_v10 = vsel %vm1377_vm3, %v3330_v4, -1e+30 }
 0x2eb   : > { %v1346_v11 = vpop.f32.mrb[43].mxu0  ;;  %1464 = vmax.xlane.f32.xlu0 %v1408_v10  ;;  %v3345_v15 = vadd.f32 %v2441_v9, %v3185_v50 }
 0x2ec   : > { %v3342_v13 = vadd.f32 %v3185_v50, %v1346_v11 }
 0x2ed   : > { %4257 = vst [vmem:[#allocation18_spill] sm:$0xff] %v3345_v15  ;;  %v1411_v26 = vsel %vm1377_vm3, %v3345_v15, -1e+30 }
 0x2ee   : > { %4256 = vst [vmem:[#allocation17_spill] sm:$0xff] %v3342_v13  ;;  %v2444_v17 = vpop.f32.mrb[44].mxu0  ;;  %1466 = vmax.xlane.f32.xlu1 %v1409_v16  ;;  %v1410_v20 = vsel %vm1377_vm3, %v3342_v13, -1e+30 }
 0x2ef   : > { %v1356_v21 = vpop.f32.mrb[45].mxu0  ;;  %1468 = vmax.xlane.f32.xlu0 %v1410_v20  ;;  %v3357_v23 = vadd.f32 %v2444_v17, %v3185_v50 }
 0x2f0   : > { %v3354_v22 = vadd.f32 %v3185_v50, %v1356_v21 }
 0x2f1   : > { %4259 = vst [vmem:[#allocation20_spill] sm:$0xff] %v3357_v23  ;;  %v1413_v34 = vsel %vm1377_vm3, %v3357_v23, -1e+30 }
 0x2f2   : > { %4258 = vst [vmem:[#allocation19_spill] sm:$0xff] %v3354_v22  ;;  %v2447_v27 = vpop.f32.mrb[46].mxu0  ;;  %1470 = vmax.xlane.f32.xlu1 %v1411_v26  ;;  %v1412_v28 = vsel %vm1377_vm3, %v3354_v22, -1e+30 }
 0x2f3   : > { %v3366_v29 = vadd.f32 %v2447_v27, %v3185_v50  ;;  %v1366_v32 = vpop.f32.mrb[47].mxu0  ;;  %1472 = vmax.xlane.f32.xlu0 %v1412_v28 }
 0x2f4   : > { %v3369_v33 = vadd.f32 %v3185_v50, %v1366_v32 }
 0x2f5   : > { %v1415_v38 = vsel %vm1377_vm3, %v3366_v29, -1e+30 }
 0x2f6   : > { %1474 = vmax.xlane.f32.xlu1 %v1413_v34  ;;  %v1414_v35 = vsel %vm1377_vm3, %v3369_v33, -1e+30 }
 0x2f7   : > { %1476 = vmax.xlane.f32.xlu0 %v1414_v35 }
 0x2fa   : > { %1478 = vmax.xlane.f32.xlu1 %v1415_v38 }
 0x347   : > { %v1419_v39 = vpop.xlane.xlu0 %1418 }
 0x348   : > { %v1481_v50 = vsel %vm1377_vm3, %v1419_v39, 0.0 }
 0x349   : > { %v1513_v40 = vsub.f32 %v3189_v52, %v1481_v50 }
 0x34b   : > { %v1546_v41 = vmul.f32 1.442695, %v1513_v40  ;;  %v1423_v44 = vpop.xlane.xlu1 %1422  ;;  %v1417_v46 = vpop.xlane.xlu0 %1416 }
 0x34c   : > { %v1483_v47 = vsel %vm1377_vm3, %v1423_v44, 0.0  ;;  %v1480_v14 = vsel %vm1377_vm3, %v1417_v46, 0.0 }
 0x34d   : > { %2635 = vpow2.f32 %v1546_v41  ;;  %v1515_v53 = vsub.f32 %v3198_v57, %v1483_v47  ;;  %v1512_v55 = vsub.f32 %v3192_v54, %v1480_v14 }
 0x34f   : > { %v1550_v56 = vmul.f32 1.442695, %v1515_v53  ;;  %v1544_v58 = vmul.f32 1.442695, %v1512_v55  ;;  %v1421_v62 = vpop.xlane.xlu1 %1420 }
 0x350   : > { %v1482_v63 = vsel %vm1377_vm3, %v1421_v62, 0.0  ;;  %v1425_v2 = vpop.xlane.xlu0 %1424 }
 0x351   : > { %2637 = vpow2.f32 %v1550_v56  ;;  %v1514_v3 = vsub.f32 %v3201_v59, %v1482_v63  ;;  %v1484_v8 = vsel %vm1377_vm3, %v1425_v2, 0.0 }
 0x352   : > { %2639 = vpow2.f32 %v1544_v58  ;;  %v1516_v9 = vsub.f32 %v3210_v0, %v1484_v8 }
 0x353   : > { %v1548_v10 = vmul.f32 1.442695, %v1514_v3  ;;  %v1427_v11 = vpop.xlane.xlu1 %1426 }
 0x354   : > { %v1552_v16 = vmul.f32 1.442695, %v1516_v9  ;;  %v1485_v17 = vsel %vm1377_vm3, %v1427_v11, 0.0  ;;  %v1429_v20 = vpop.xlane.xlu0 %1428 }
 0x355   : > { %2641 = vpow2.f32 %v1548_v10  ;;  %v1517_v21 = vsub.f32 %v3213_v1, %v1485_v17  ;;  %v1486_v26 = vsel %vm1377_vm3, %v1429_v20, 0.0 }
 0x356   : > { %v1518_v27 = vsub.f32 %v3222_v6, %v1486_v26  ;;  %2643 = vpow2.f32 %v1552_v16 }
 0x357   : > { %v3401_v28 = vpop.eup %2635  ;;  %v1554_v32 = vmul.f32 1.442695, %v1517_v21  ;;  %v1431_v34 = vpop.xlane.xlu1 %1430 }
 0x358   : > { %v1556_v35 = vmul.f32 1.442695, %v1518_v27  ;;  %v1487_v38 = vsel %vm1377_vm3, %v1431_v34, 0.0  ;;  %v1433_v39 = vpop.xlane.xlu0 %1432  ;;  %v3408_v50 = vsel %vm1377_vm3, %v3401_v28, 0.0 }
 0x359   : > { %2645 = vpow2.f32 %v1554_v32  ;;  %v1519_v40 = vsub.f32 %v3225_v7, %v1487_v38  ;;  %v1488_v41 = vsel %vm1377_vm3, %v1433_v39, 0.0  ;;  %1642 = vadd.xlane.f32.xlu1 %v3408_v50 }
 0x35a   : > { %v1520_v44 = vsub.f32 %v3234_v12, %v1488_v41  ;;  %2647 = vpow2.f32 %v1556_v35 }
 0x35b   : > { %v3415_v46 = vpop.eup %2637  ;;  %v1558_v47 = vmul.f32 1.442695, %v1519_v40  ;;  %v1435_v14 = vpop.xlane.xlu1 %1434 }
 0x35c   : > { %v3417_v53 = vpop.eup %2639  ;;  %v1560_v55 = vmul.f32 1.442695, %v1520_v44  ;;  %v1489_v56 = vsel %vm1377_vm3, %v1435_v14, 0.0  ;;  %v1437_v58 = vpop.xlane.xlu0 %1436  ;;  %v3424_v62 = vsel %vm1377_vm3, %v3415_v46, 0.0 }
 0x35d   : > { %2649 = vpow2.f32 %v1558_v47  ;;  %v1521_v63 = vsub.f32 %v3237_v45, %v1489_v56  ;;  %v1490_v2 = vsel %vm1377_vm3, %v1437_v58, 0.0  ;;  %1646 = vadd.xlane.f32.xlu1 %v3424_v62  ;;  %v3433_v3 = vsel %vm1377_vm3, %v3417_v53, 0.0 }
 0x35e   : > { %v1522_v8 = vsub.f32 %v3246_v18, %v1490_v2  ;;  %1640 = vadd.xlane.f32.xlu0 %v3433_v3  ;;  %2651 = vpow2.f32 %v1560_v55 }
 0x35f   : > { %v3437_v9 = vpop.eup %2641  ;;  %v1562_v10 = vmul.f32 1.442695, %v1521_v63  ;;  %v1439_v11 = vpop.xlane.xlu1 %1438 }
 0x360   : > { %v1564_v16 = vmul.f32 1.442695, %v1522_v8  ;;  %v1491_v17 = vsel %vm1377_vm3, %v1439_v11, 0.0  ;;  %v1441_v20 = vpop.xlane.xlu0 %1440  ;;  %v3444_v21 = vsel %vm1377_vm3, %v3437_v9, 0.0  ;;  %v3449_v32 = vpop.eup %2643 }
 0x361   : > { %2653 = vpow2.f32 %v1562_v10  ;;  %v1523_v26 = vsub.f32 %v3249_v19, %v1491_v17  ;;  %v1492_v27 = vsel %vm1377_vm3, %v1441_v20, 0.0  ;;  %v3469_v56 = vsel %vm1377_vm3, %v3449_v32, 0.0 }
 0x362   : > { %v1524_v34 = vsub.f32 %v3258_v24, %v1492_v27  ;;  %1644 = vadd.xlane.f32.xlu0 %v3444_v21  ;;  %2655 = vpow2.f32 %v1564_v16 }
 0x363   : > { %v3453_v35 = vpop.eup %2645  ;;  %v1566_v38 = vmul.f32 1.442695, %v1523_v26  ;;  %v1443_v39 = vpop.xlane.xlu1 %1442 }
 0x364   : > { %v1568_v40 = vmul.f32 1.442695, %v1524_v34  ;;  %v1493_v41 = vsel %vm1377_vm3, %v1443_v39, 0.0  ;;  %v1445_v44 = vpop.xlane.xlu0 %1444  ;;  %v3460_v47 = vsel %vm1377_vm3, %v3453_v35, 0.0  ;;  %v3471_v58 = vpop.eup %2647 }
 0x365   : > { %2657 = vpow2.f32 %v1566_v38  ;;  %v1525_v14 = vsub.f32 %v3261_v25, %v1493_v41  ;;  %v1494_v55 = vsel %vm1377_vm3, %v1445_v44, 0.0  ;;  %1650 = vadd.xlane.f32.xlu1 %v3460_v47  ;;  %v3491_v34 = vsel %vm1377_vm3, %v3471_v58, 0.0 }
 0x366   : > { %v1526_v63 = vsub.f32 %v3270_v30, %v1494_v55  ;;  %1648 = vadd.xlane.f32.xlu0 %v3469_v56  ;;  %2659 = vpow2.f32 %v1568_v40 }
 0x367   : > { %v3475_v2 = vpop.eup %2649  ;;  %v1570_v8 = vmul.f32 1.442695, %v1525_v14  ;;  %v1447_v10 = vpop.xlane.xlu1 %1446 }
 0x368   : > { %v1572_v11 = vmul.f32 1.442695, %v1526_v63  ;;  %v1495_v16 = vsel %vm1377_vm3, %v1447_v10, 0.0  ;;  %v1449_v17 = vpop.xlane.xlu0 %1448  ;;  %v3482_v20 = vsel %vm1377_vm3, %v3475_v2, 0.0  ;;  %v3493_v38 = vpop.eup %2651 }
 0x369   : > { %2661 = vpow2.f32 %v1570_v8  ;;  %v1527_v26 = vsub.f32 %v3273_v31, %v1495_v16  ;;  %v1496_v27 = vsel %vm1377_vm3, %v1449_v17, 0.0  ;;  %1654 = vadd.xlane.f32.xlu1 %v3482_v20 }
 0x36a   : > { %v1528_v39 = vsub.f32 %v3282_v36, %v1496_v27  ;;  %1652 = vadd.xlane.f32.xlu0 %v3491_v34  ;;  %2663 = vpow2.f32 %v1572_v11  ;;  %v3513_v11 = vsel %vm1377_vm3, %v3493_v38, 0.0 }
 0x36b   : > { %v3497_v40 = vpop.eup %2653  ;;  %v1574_v41 = vmul.f32 1.442695, %v1527_v26  ;;  %v1451_v44 = vpop.xlane.xlu1 %1450 }
 0x36c   : > { %v1576_v14 = vmul.f32 1.442695, %v1528_v39  ;;  %v1497_v55 = vsel %vm1377_vm3, %v1451_v44, 0.0  ;;  %v1453_v63 = vpop.xlane.xlu0 %1452  ;;  %v3504_v8 = vsel %vm1377_vm3, %v3497_v40, 0.0  ;;  %v3515_v17 = vpop.eup %2655 }
 0x36d   : > { %2665 = vpow2.f32 %v1574_v41  ;;  %v1529_v10 = vsub.f32 %v3285_v37, %v1497_v55  ;;  %v1498_v16 = vsel %vm1377_vm3, %v1453_v63, 0.0  ;;  %1658 = vadd.xlane.f32.xlu1 %v3504_v8 }
 0x36e   : > { %v1530_v26 = vsub.f32 %v3294_v42, %v1498_v16  ;;  %1656 = vadd.xlane.f32.xlu0 %v3513_v11  ;;  %2667 = vpow2.f32 %v1576_v14  ;;  %v3535_v14 = vsel %vm1377_vm3, %v3515_v17, 0.0 }
 0x36f   : > { %v3519_v27 = vpop.eup %2657  ;;  %v1578_v39 = vmul.f32 1.442695, %v1529_v10  ;;  %v1455_v41 = vpop.xlane.xlu1 %1454 }
 0x370   : > { %v1580_v44 = vmul.f32 1.442695, %v1530_v26  ;;  %v1499_v55 = vsel %vm1377_vm3, %v1455_v41, 0.0  ;;  %v1457_v63 = vpop.xlane.xlu0 %1456  ;;  %v3526_v36 = vsel %vm1377_vm3, %v3519_v27, 0.0  ;;  %v3537_v10 = vpop.eup %2659 }
 0x371   : > { %2669 = vpow2.f32 %v1578_v39  ;;  %v1531_v16 = vsub.f32 %v3297_v43, %v1499_v55  ;;  %v1500_v42 = vsel %vm1377_vm3, %v1457_v63, 0.0  ;;  %1662 = vadd.xlane.f32.xlu1 %v3526_v36  ;;  %4260 = vst [vmem:[#allocation21_spill] sm:$0xff] %v3537_v10 }
 0x372   : > { %v1532_v26 = vsub.f32 %v3306_v48, %v1500_v42  ;;  %1660 = vadd.xlane.f32.xlu0 %v3535_v14  ;;  %2671 = vpow2.f32 %v1580_v44  ;;  %v3557_v44 = vsel %vm1377_vm3, %v3537_v10, 0.0 }
 0x373   : > { %v3541_v41 = vpop.eup %2661  ;;  %v1582_v39 = vmul.f32 1.442695, %v1531_v16  ;;  %v1459_v55 = vpop.xlane.xlu1 %1458 }
 0x374   : > { %v1584_v43 = vmul.f32 1.442695, %v1532_v26  ;;  %v1501_v63 = vsel %vm1377_vm3, %v1459_v55, 0.0  ;;  %v1461_v37 = vpop.xlane.xlu0 %1460  ;;  %v3548_v30 = vsel %vm1377_vm3, %v3541_v41, 0.0  ;;  %v3559_v16 = vpop.eup %2663 }
 0x375   : > { %2673 = vpow2.f32 %v1582_v39  ;;  %v1533_v42 = vsub.f32 %v3309_v51, %v1501_v63  ;;  %v1502_v48 = vsel %vm1377_vm3, %v1461_v37, 0.0  ;;  %1666 = vadd.xlane.f32.xlu1 %v3548_v30  ;;  %4261 = vst [vmem:[#allocation22_spill] sm:$0xff] %v3559_v16 }
 0x376   : > { %v1534_v26 = vsub.f32 %v3318_v60, %v1502_v48  ;;  %1664 = vadd.xlane.f32.xlu0 %v3557_v44  ;;  %2675 = vpow2.f32 %v1584_v43  ;;  %v3579_v43 = vsel %vm1377_vm3, %v3559_v16, 0.0 }
 0x377   : > { %v3563_v55 = vpop.eup %2665  ;;  %v1586_v39 = vmul.f32 1.442695, %v1533_v42  ;;  %v1463_v63 = vpop.xlane.xlu1 %1462  ;;  %4264 = vst [vmem:[#allocation25_spill] sm:$0xff] %v3579_v43 }
 0x378   : > { %4262 = vst [vmem:[#allocation23_spill] sm:$0xff] %v3563_v55  ;;  %v1588_v51 = vmul.f32 1.442695, %v1534_v26  ;;  %v1503_v37 = vsel %vm1377_vm3, %v1463_v63, 0.0  ;;  %v1465_v31 = vpop.xlane.xlu0 %1464  ;;  %v3570_v10 = vsel %vm1377_vm3, %v3563_v55, 0.0  ;;  %v3581_v42 = vpop.eup %2667 }
 0x379   : > { %4263 = vst [vmem:[#allocation24_spill] sm:$0xff] %v3570_v10  ;;  %2677 = vpow2.f32 %v1586_v39  ;;  %v1535_v48 = vsub.f32 %v3321_v61, %v1503_v37  ;;  %v1504_v60 = vsel %vm1377_vm3, %v1465_v31, 0.0  ;;  %1670 = vadd.xlane.f32.xlu1 %v3570_v10  ;;  %4265 = vst [vmem:[#allocation26_spill] sm:$0xff] %v3581_v42 }
 0x37a   : > { %v1536_v26 = vsub.f32 %v3330_v4, %v1504_v60  ;;  %1668 = vadd.xlane.f32.xlu0 %v3579_v43  ;;  %2679 = vpow2.f32 %v1588_v51  ;;  %v3601_v51 = vsel %vm1377_vm3, %v3581_v42, 0.0 }
 0x37b   : > { %v3585_v63 = vpop.eup %2669  ;;  %v1590_v39 = vmul.f32 1.442695, %v1535_v48  ;;  %v1467_v37 = vpop.xlane.xlu1 %1466  ;;  %4268 = vst [vmem:[#allocation29_spill] sm:$0xff] %v3601_v51 }
 0x37c   : > { %4266 = vst [vmem:[#allocation27_spill] sm:$0xff] %v3585_v63  ;;  %v1592_v61 = vmul.f32 1.442695, %v1536_v26  ;;  %v1505_v31 = vsel %vm1377_vm3, %v1467_v37, 0.0  ;;  %v1469_v55 = vpop.xlane.xlu0 %1468  ;;  %v3592_v16 = vsel %vm1377_vm3, %v3585_v63, 0.0  ;;  %v3603_v48 = vpop.eup %2671 }
 0x37d   : > { %4267 = vst [vmem:[#allocation28_spill] sm:$0xff] %v3592_v16  ;;  %2681 = vpow2.f32 %v1590_v39  ;;  %v1537_v60 = vsub.f32 %v3333_v5, %v1505_v31  ;;  %v1506_v4 = vsel %vm1377_vm3, %v1469_v55, 0.0  ;;  %1674 = vadd.xlane.f32.xlu1 %v3592_v16  ;;  %4269 = vst [vmem:[#allocation30_spill] sm:$0xff] %v3603_v48 }
 0x37e   : > { %v1538_v26 = vsub.f32 %v3342_v13, %v1506_v4  ;;  %1672 = vadd.xlane.f32.xlu0 %v3601_v51  ;;  %2683 = vpow2.f32 %v1592_v61  ;;  %v3623_v61 = vsel %vm1377_vm3, %v3603_v48, 0.0  ;;  %v1865_v51 = vsel %vm3708_vm8, %v3189_v52, 0.0 }
 0x37f   : > { %v3607_v37 = vpop.eup %2673  ;;  %v1594_v39 = vmul.f32 1.442695, %v1537_v60  ;;  %v1471_v31 = vpop.xlane.xlu1 %1470  ;;  %4272 = vst [vmem:[#allocation33_spill] sm:$0xff] %v3623_v61 }
 0x380   : > { %4270 = vst [vmem:[#allocation31_spill] sm:$0xff] %v3607_v37  ;;  %v1596_v5 = vmul.f32 1.442695, %v1538_v26  ;;  %v1507_v55 = vsel %vm1377_vm3, %v1471_v31, 0.0  ;;  %v1473_v63 = vpop.xlane.xlu0 %1472  ;;  %v3614_v42 = vsel %vm1377_vm3, %v3607_v37, 0.0  ;;  %v3625_v60 = vpop.eup %2675 }
 0x381   : > { %4271 = vst [vmem:[#allocation32_spill] sm:$0xff] %v3614_v42  ;;  %2685 = vpow2.f32 %v1594_v39  ;;  %v1539_v4 = vsub.f32 %v3345_v15, %v1507_v55  ;;  %v1508_v13 = vsel %vm1377_vm3, %v1473_v63, 0.0  ;;  %1678 = vadd.xlane.f32.xlu1 %v3614_v42  ;;  %4273 = vst [vmem:[#allocation34_spill] sm:$0xff] %v3625_v60 }
 0x382   : > { %v1540_v26 = vsub.f32 %v3354_v22, %v1508_v13  ;;  %1676 = vadd.xlane.f32.xlu0 %v3623_v61  ;;  %2687 = vpow2.f32 %v1596_v5  ;;  %v3645_v5 = vsel %vm1377_vm3, %v3625_v60, 0.0 }
 0x383   : > { %v3629_v31 = vpop.eup %2677  ;;  %v1598_v39 = vmul.f32 1.442695, %v1539_v4  ;;  %v1475_v55 = vpop.xlane.xlu1 %1474  ;;  %4276 = vst [vmem:[#allocation37_spill] sm:$0xff] %v3645_v5 }
 0x384   : > { %4274 = vst [vmem:[#allocation35_spill] sm:$0xff] %v3629_v31  ;;  %v1600_v15 = vmul.f32 1.442695, %v1540_v26  ;;  %v1509_v63 = vsel %vm1377_vm3, %v1475_v55, 0.0  ;;  %v1477_v37 = vpop.xlane.xlu0 %1476  ;;  %v3636_v48 = vsel %vm1377_vm3, %v3629_v31, 0.0  ;;  %v3647_v4 = vpop.eup %2679 }
 0x385   : > { %4275 = vst [vmem:[#allocation36_spill] sm:$0xff] %v3636_v48  ;;  %2689 = vpow2.f32 %v1598_v39  ;;  %v1541_v13 = vsub.f32 %v3357_v23, %v1509_v63  ;;  %v1510_v22 = vsel %vm1377_vm3, %v1477_v37, 0.0  ;;  %1682 = vadd.xlane.f32.xlu1 %v3636_v48  ;;  %4277 = vst [vmem:[#allocation38_spill] sm:$0xff] %v3647_v4 }
 0x386   : > { %v1542_v26 = vsub.f32 %v3369_v33, %v1510_v22  ;;  %1680 = vadd.xlane.f32.xlu0 %v3645_v5  ;;  %2691 = vpow2.f32 %v1600_v15  ;;  %v3665_v22 = vsel %vm1377_vm3, %v3647_v4, 0.0 }
 0x387   : > { %v3651_v55 = vpop.eup %2681  ;;  %v1602_v39 = vmul.f32 1.442695, %v1541_v13  ;;  %v1479_v63 = vpop.xlane.xlu1 %1478  ;;  %4280 = vst [vmem:[#allocation41_spill] sm:$0xff] %v3665_v22 }
 0x388   : > { %4278 = vst [vmem:[#allocation39_spill] sm:$0xff] %v3651_v55  ;;  %v1604_v23 = vmul.f32 1.442695, %v1542_v26  ;;  %v1511_v37 = vsel %vm1377_vm3, %v1479_v63, 0.0  ;;  %v3658_v60 = vsel %vm1377_vm3, %v3651_v55, 0.0  ;;  %v3667_v15 = vpop.eup %2683 }
 0x389   : > { %4279 = vst [vmem:[#allocation40_spill] sm:$0xff] %v3658_v60  ;;  %2693 = vpow2.f32 %v1602_v39  ;;  %v1543_v31 = vsub.f32 %v3366_v29, %v1511_v37  ;;  %1686 = vadd.xlane.f32.xlu1 %v3658_v60  ;;  %4281 = vst [vmem:[#allocation42_spill] sm:$0xff] %v3667_v15  ;;  %v3681_v63 = vsel %vm1377_vm3, %v3667_v15, 0.0 }
 0x38a   : > { %2695 = vpow2.f32 %v1604_v23  ;;  %1684 = vadd.xlane.f32.xlu0 %v3665_v22  ;;  %4284 = vst [vmem:[#allocation45_spill] sm:$0xff] %v3681_v63 }
 0x38b   : > { %v3670_v13 = vpop.eup %2685  ;;  %v1606_v26 = vmul.f32 1.442695, %v1543_v31 }
 0x38c   : > { %4282 = vst [vmem:[#allocation43_spill] sm:$0xff] %v3670_v13  ;;  %v3675_v39 = vsel %vm1377_vm3, %v3670_v13, 0.0  ;;  %v3683_v37 = vpop.eup %2687 }
 0x38d   : > { %4283 = vst [vmem:[#allocation44_spill] sm:$0xff] %v3675_v39  ;;  %2697 = vpow2.f32 %v1606_v26  ;;  %1690 = vadd.xlane.f32.xlu1 %v3675_v39  ;;  %4285 = vst [vmem:[#allocation46_spill] sm:$0xff] %v3683_v37  ;;  %v3699_v26 = vsel %vm1377_vm3, %v3683_v37, 0.0  ;;  %v1894_v37 = vsel %vm3708_vm8, %v3369_v33, 0.0 }
 0x38e   : > { %1688 = vadd.xlane.f32.xlu0 %v3681_v63  ;;  %4288 = vst [vmem:[#allocation49_spill] sm:$0xff] %v3699_v26 }
 0x38f   : > { %v3686_v23 = vpop.eup %2689 }
 0x390   : > { %4286 = vst [vmem:[#allocation47_spill] sm:$0xff] %v3686_v23  ;;  %v3693_v31 = vsel %vm1377_vm3, %v3686_v23, 0.0  ;;  %v3703_v15 = vpop.eup %2691 }
 0x391   : > { %4287 = vst [vmem:[#allocation48_spill] sm:$0xff] %v3693_v31  ;;  %1694 = vadd.xlane.f32.xlu1 %v3693_v31  ;;  %4289 = vst [vmem:[#allocation50_spill] sm:$0xff] %v3703_v15 }
 0x392   : > { %1692 = vadd.xlane.f32.xlu0 %v3699_v26  ;;  %v3728_v26 = vsel %vm1377_vm3, %v3703_v15, 0.0 }
 0x393   : > { %v3706_v63 = vpop.eup %2693  ;;  %4296 = vst [vmem:[#allocation53_spill] sm:$0xff] %v3728_v26 }
 0x394   : > { %4290 = vst [vmem:[#allocation51_spill] sm:$0xff] %v3706_v63  ;;  %v2696_v31 = vpop.eup %2695  ;;  %v3718_v13 = vsel %vm1377_vm3, %v3706_v63, 0.0  ;;  %v1895_v63 = vsel %vm3708_vm8, %v3366_v29, 0.0 }
 0x395   : > { %4293 = vst [vmem:[#allocation52_spill] sm:$0xff] %v3718_v13  ;;  %1698 = vadd.xlane.f32.xlu1 %v3718_v13  ;;  %v3732_v4 = vsel %vm3720_vm9, %v2696_v31, %v1894_v37  ;;  %v3749_v37 = vsel %vm1377_vm3, %v2696_v31, 0.0 }
 0x396   : > { %4297 = vst [vmem:[#allocation54_spill] sm:$0xff] %v3732_v4  ;;  %1696 = vadd.xlane.f32.xlu0 %v3728_v26  ;;  %4300 = vst [vmem:[#allocation57_spill] sm:$0xff] %v3749_v37 }
 0x397   : > { %v2698_v33 = vpop.eup %2697 }
 0x398   : > { %v3740_v13 = vsel %vm1377_vm3, %v2698_v33, 0.0  ;;  %v3744_v15 = vsel %vm3720_vm9, %v2698_v33, %v1895_v63 }
 0x399   : > { %4298 = vst [vmem:[#allocation55_spill] sm:$0xff] %v3740_v13  ;;  %4299 = vst [vmem:[#allocation56_spill] sm:$0xff] %v3744_v15  ;;  %1702 = vadd.xlane.f32.xlu1 %v3740_v13 }
 0x39a   : > { %1700 = vadd.xlane.f32.xlu0 %v3749_v37 }
 0x3a0   : > { %v4352_v39 = vld [vmem:[#allocation56_spill] sm:$0xff] }
 0x3e6   : > { %v1643_v4 = vpop.xlane.xlu1 %1642 }
 0x3e7   : > { %2699 = vrcp.f32 %v1643_v4 }
 0x3ea   : > { %v1647_v29 = vpop.xlane.xlu1 %1646 }
 0x3eb   : > { %2701 = vrcp.f32 %v1647_v29  ;;  %v1641_v26 = vpop.xlane.xlu0 %1640 }
 0x3ec   : > { %2703 = vrcp.f32 %v1641_v26 }
 0x3ef   : > { %v1645_v22 = vpop.xlane.xlu0 %1644 }
 0x3f0   : > { %2705 = vrcp.f32 %v1645_v22 }
 0x3f1   : > { %v2700_v55 = vpop.eup %2699 }
 0x3f2   : > { %v1737_v63 = vmul.f32 %v2700_v55, %v1643_v4  ;;  %v1651_v33 = vpop.xlane.xlu1 %1650 }
 0x3f3   : > { %2707 = vrcp.f32 %v1651_v33  ;;  %v1649_v15 = vpop.xlane.xlu0 %1648 }
 0x3f4   : > { %v1769_v13 = vsub.f32 2.0, %v1737_v63  ;;  %2709 = vrcp.f32 %v1649_v15  ;;  %v1897_v63 = vsel %vm3720_vm9, %v3401_v28, %v1865_v51  ;;  %v1867_v28 = vsel %vm3708_vm8, %v3198_v57, 0.0 }
 0x3f5   : > { %v2702_v31 = vpop.eup %2701 }
 0x3f6   : > { %v2704_v37 = vpop.eup %2703  ;;  %v1801_v60 = vmul.f32 %v2700_v55, %v1769_v13  ;;  %v1739_v5 = vmul.f32 %v2702_v31, %v1647_v29  ;;  %v1655_v48 = vpop.xlane.xlu1 %1654 }
 0x3f7   : > { %v1736_v61 = vmul.f32 %v2704_v37, %v1641_v26  ;;  %2711 = vrcp.f32 %v1655_v48  ;;  %v1653_v42 = vpop.xlane.xlu0 %1652 }
 0x3f8   : > { %v1833_v4 = vmul.f32 %v1801_v60, %v3408_v50  ;;  %v1771_v16 = vsub.f32 2.0, %v1739_v5  ;;  %2713 = vrcp.f32 %v1653_v42 }
 0x3f9   : > { %v1768_v43 = vsub.f32 2.0, %v1736_v61 }
 0x3fa   : > { %v2706_v10 = vpop.eup %2705  ;;  %v1929_v55 = vsel %vm1377_vm3, %v1833_v4, %v1897_v63  ;;  %v1803_v13 = vmul.f32 %v2702_v31, %v1771_v16  ;;  %v1659_v26 = vpop.xlane.xlu1 %1658  ;;  %v1864_v16 = vsel %vm3708_vm8, %v3192_v54, 0.0 }
 0x3fb   : > { %1961 = vst [vmem:[%s3764_s16 + $0x8] sm:$0xff] %v1929_v55  ;;  %v1800_v52 = vmul.f32 %v2704_v37, %v1768_v43  ;;  %v1738_v29 = vmul.f32 %v2706_v10, %v1645_v22  ;;  %2715 = vrcp.f32 %v1659_v26  ;;  %v1657_v50 = vpop.xlane.xlu0 %1656  ;;  %v1899_v43 = vsel %vm3720_vm9, %v3415_v46, %v1867_v28 }
 0x3fc   : > { %v1835_v51 = vmul.f32 %v1803_v13, %v3424_v62  ;;  %2717 = vrcp.f32 %v1657_v50  ;;  %v1896_v62 = vsel %vm3720_vm9, %v3417_v53, %v1864_v16  ;;  %v1866_v13 = vsel %vm3708_vm8, %v3201_v59, 0.0 }
 0x3fd   : > { %v2708_v61 = vpop.eup %2707  ;;  %v1832_v60 = vmul.f32 %v1800_v52, %v3433_v3  ;;  %v1770_v5 = vsub.f32 2.0, %v1738_v29 }
 0x3fe   : > { %v2710_v22 = vpop.eup %2709  ;;  %v1931_v57 = vsel %vm1377_vm3, %v1835_v51, %v1899_v43  ;;  %v1741_v37 = vmul.f32 %v2708_v61, %v1651_v33  ;;  %v1663_v31 = vpop.xlane.xlu1 %1662 }
 0x3ff   : > { %1963 = vst [vmem:[%s3764_s16 + $0x18] sm:$0xff] %v1931_v57  ;;  %v1928_v54 = vsel %vm1377_vm3, %v1832_v60, %v1896_v62  ;;  %v1802_v4 = vmul.f32 %v2706_v10, %v1770_v5  ;;  %v1740_v63 = vmul.f32 %v2710_v22, %v1649_v15  ;;  %2719 = vrcp.f32 %v1663_v31  ;;  %v1661_v46 = vpop.xlane.xlu0 %1660 }
 0x400   : > { %1960 = vst [vmem:[%s3764_s16] sm:$0xff] %v1928_v54  ;;  %v1773_v3 = vsub.f32 2.0, %v1741_v37  ;;  %2721 = vrcp.f32 %v1661_v46  ;;  %v1898_v10 = vsel %vm3720_vm9, %v3437_v9, %v1866_v13 }
 0x401   : > { %v2712_v55 = vpop.eup %2711  ;;  %v1834_v53 = vmul.f32 %v1802_v4, %v3444_v21  ;;  %v1772_v33 = vsub.f32 2.0, %v1740_v63  ;;  %v1869_v21 = vsel %vm3708_vm8, %v3213_v1, 0.0  ;;  %v1871_v63 = vsel %vm3708_vm8, %v3225_v7, 0.0 }
 0x402   : > { %v2714_v52 = vpop.eup %2713  ;;  %v1805_v15 = vmul.f32 %v2708_v61, %v1773_v3  ;;  %v1743_v29 = vmul.f32 %v2712_v55, %v1655_v48  ;;  %v3794_v28 = vpop.xlane.xlu1 %1666  ;;  %v1901_v60 = vsel %vm3720_vm9, %v3453_v35, %v1869_v21 }
 0x403   : > { %v1930_v51 = vsel %vm1377_vm3, %v1834_v53, %v1898_v10  ;;  %v1804_v16 = vmul.f32 %v2710_v22, %v1772_v33  ;;  %v1742_v43 = vmul.f32 %v2714_v52, %v1653_v42  ;;  %2723 = vrcp.f32 %v3794_v28  ;;  %v3799_v59 = vpop.xlane.xlu0 %1664 }
 0x404   : > { %1962 = vst [vmem:[%s3764_s16 + $0x10] sm:$0xff] %v1930_v51  ;;  %v1837_v9 = vmul.f32 %v1805_v15, %v3460_v47  ;;  %v1775_v48 = vsub.f32 2.0, %v1743_v29  ;;  %2725 = vrcp.f32 %v3799_v59  ;;  %v1868_v42 = vsel %vm3708_vm8, %v3210_v0, 0.0 }
 0x405   : > { %v2716_v61 = vpop.eup %2715  ;;  %v1836_v5 = vmul.f32 %v1804_v16, %v3469_v56  ;;  %v1774_v1 = vsub.f32 2.0, %v1742_v43  ;;  %v1900_v57 = vsel %vm3720_vm9, %v3449_v32, %v1868_v42  ;;  %v1873_v51 = vsel %vm3708_vm8, %v3237_v45, 0.0 }
 0x406   : > { %v2718_v22 = vpop.eup %2717  ;;  %v1933_v47 = vsel %vm1377_vm3, %v1837_v9, %v1901_v60  ;;  %v1807_v62 = vmul.f32 %v2712_v55, %v1775_v48  ;;  %v1745_v37 = vmul.f32 %v2716_v61, %v1659_v26  ;;  %v3819_v54 = vpop.xlane.xlu1 %1670  ;;  %v1903_v55 = vsel %vm3720_vm9, %v3475_v2, %v1871_v63 }
 0x407   : > { %1965 = vst [vmem:[%s3764_s16 + $0x28] sm:$0xff] %v1933_v47  ;;  %v1932_v0 = vsel %vm1377_vm3, %v1836_v5, %v1900_v57  ;;  %v1806_v35 = vmul.f32 %v2714_v52, %v1774_v1  ;;  %v1744_v4 = vmul.f32 %v2718_v22, %v1657_v50  ;;  %2727 = vrcp.f32 %v3819_v54  ;;  %v3825_v56 = vpop.xlane.xlu0 %1668 }
 0x408   : > { %1964 = vst [vmem:[%s3764_s16 + $0x20] sm:$0xff] %v1932_v0  ;;  %v1839_v32 = vmul.f32 %v1807_v62, %v3482_v20  ;;  %v1777_v26 = vsub.f32 2.0, %v1745_v37  ;;  %2729 = vrcp.f32 %v3825_v56  ;;  %v1870_v50 = vsel %vm3708_vm8, %v3222_v6, 0.0 }
 0x409   : > { %v2720_v3 = vpop.eup %2719  ;;  %v1838_v13 = vmul.f32 %v1806_v35, %v3491_v34  ;;  %v1776_v7 = vsub.f32 2.0, %v1744_v4  ;;  %v1902_v33 = vsel %vm3720_vm9, %v3471_v58, %v1870_v50  ;;  %v1905_v43 = vsel %vm3720_vm9, %v3497_v40, %v1873_v51 }
 0x40a   : > { %v2722_v53 = vpop.eup %2721  ;;  %v1935_v20 = vsel %vm1377_vm3, %v1839_v32, %v1903_v55  ;;  %v1809_v52 = vmul.f32 %v2716_v61, %v1777_v26  ;;  %v1747_v10 = vmul.f32 %v2720_v3, %v1663_v31  ;;  %v3845_v15 = vpop.xlane.xlu1 %1674 }
 0x40b   : > { %1967 = vst [vmem:[%s3764_s16 + $0x38] sm:$0xff] %v1935_v20  ;;  %v1934_v6 = vsel %vm1377_vm3, %v1838_v13, %v1902_v33  ;;  %v1808_v2 = vmul.f32 %v2718_v22, %v1776_v7  ;;  %v1746_v29 = vmul.f32 %v2722_v53, %v1661_v46  ;;  %2731 = vrcp.f32 %v3845_v15  ;;  %v3851_v34 = vpop.xlane.xlu0 %1672  ;;  %v4301_v13 = vld [vmem:[#allocation21_spill] sm:$0xff] }
 0x40c   : > { %1966 = vst [vmem:[%s3764_s16 + $0x30] sm:$0xff] %v1934_v6  ;;  %v1841_v58 = vmul.f32 %v1809_v52, %v3504_v8  ;;  %v1779_v31 = vsub.f32 2.0, %v1747_v10  ;;  %2733 = vrcp.f32 %v3851_v34  ;;  %v1872_v46 = vsel %vm3708_vm8, %v3234_v12, 0.0  ;;  %v4302_v10 = vld [vmem:[#allocation6_spill] sm:$0xff] }
 0x40d   : > { %v2724_v16 = vpop.eup %2723  ;;  %v1840_v21 = vmul.f32 %v1808_v2, %v3513_v11  ;;  %v1778_v45 = vsub.f32 2.0, %v1746_v29  ;;  %v1904_v48 = vsel %vm3720_vm9, %v3493_v38, %v1872_v46  ;;  %v1875_v38 = vsel %vm3708_vm8, %v3249_v19, 0.0  ;;  %v4306_v46 = vld [vmem:[#allocation25_spill] sm:$0xff] }
 0x40e   : > { %v2726_v9 = vpop.eup %2725  ;;  %v1937_v8 = vsel %vm1377_vm3, %v1841_v58, %v1905_v43  ;;  %v1811_v61 = vmul.f32 %v2720_v3, %v1779_v31  ;;  %v1749_v42 = vmul.f32 %v2724_v16, %v3794_v28  ;;  %v3872_v12 = vpop.xlane.xlu1 %1678  ;;  %v1907_v47 = vsel %vm3720_vm9, %v3519_v27, %v1875_v38  ;;  %v4304_v58 = vld [vmem:[#allocation5_spill] sm:$0xff]  ;;  %v4305_v31 = vld [vmem:[#allocation23_spill] sm:$0xff] }
 0x40f   : > { %1969 = vst [vmem:[%s3764_s16 + $0x48] sm:$0xff] %v1937_v8  ;;  %v1936_v40 = vsel %vm1377_vm3, %v1840_v21, %v1904_v48  ;;  %v1810_v60 = vmul.f32 %v2722_v53, %v1778_v45  ;;  %v1748_v11 = vmul.f32 %v2726_v9, %v3799_v59  ;;  %2735 = vrcp.f32 %v3872_v12  ;;  %v3879_v5 = vpop.xlane.xlu0 %1676  ;;  %v4307_v8 = vld [vmem:[#allocation22_spill] sm:$0xff] }
 0x410   : > { %1968 = vst [vmem:[%s3764_s16 + $0x40] sm:$0xff] %v1936_v40  ;;  %v1843_v28 = vmul.f32 %v1811_v61, %v3526_v36  ;;  %v1781_v1 = vsub.f32 2.0, %v1749_v42  ;;  %2737 = vrcp.f32 %v3879_v5  ;;  %v1874_v59 = vsel %vm3708_vm8, %v3246_v18, 0.0 }
 0x411   : > { %v2728_v22 = vpop.eup %2727  ;;  %v1842_v57 = vmul.f32 %v1810_v60, %v3535_v14  ;;  %v1780_v19 = vsub.f32 2.0, %v1748_v11  ;;  %v1906_v37 = vsel %vm3720_vm9, %v3515_v17, %v1874_v59  ;;  %v1877_v17 = vsel %vm3708_vm8, %v3261_v25, 0.0 }
 0x412   : > { %v2730_v62 = vpop.eup %2729  ;;  %v1939_v36 = vsel %vm1377_vm3, %v1843_v28, %v1907_v47  ;;  %v1813_v0 = vmul.f32 %v2724_v16, %v1781_v1  ;;  %v1751_v35 = vmul.f32 %v2728_v22, %v3819_v54  ;;  %v3900_v18 = vpop.xlane.xlu1 %1682  ;;  %v1909_v3 = vsel %vm3720_vm9, %v3541_v41, %v1877_v17  ;;  %v4308_v1 = vld [vmem:[#allocation8_spill] sm:$0xff] }
 0x413   : > { %1971 = vst [vmem:[%s3764_s16 + $0x58] sm:$0xff] %v1939_v36  ;;  %v1938_v27 = vsel %vm1377_vm3, %v1842_v57, %v1906_v37  ;;  %v1812_v4 = vmul.f32 %v2726_v9, %v1780_v19  ;;  %v1750_v14 = vmul.f32 %v2730_v62, %v3825_v56  ;;  %2739 = vrcp.f32 %v3900_v18  ;;  %v3907_v63 = vpop.xlane.xlu0 %1680  ;;  %v4310_v19 = vld [vmem:[#allocation7_spill] sm:$0xff]  ;;  %v4312_v37 = vld [vmem:[#allocation29_spill] sm:$0xff] }
 0x414   : > { %1970 = vst [vmem:[%s3764_s16 + $0x50] sm:$0xff] %v1938_v27  ;;  %v1845_v54 = vmul.f32 %v1813_v0, %v3548_v30  ;;  %v1783_v32 = vsub.f32 2.0, %v1751_v35  ;;  %2741 = vrcp.f32 %v3907_v63  ;;  %v1876_v56 = vsel %vm3708_vm8, %v3258_v24, 0.0 }
 0x415   : > { %v2732_v26 = vpop.eup %2731  ;;  %v1844_v50 = vmul.f32 %v1812_v4, %v3557_v44  ;;  %v1782_v25 = vsub.f32 2.0, %v1750_v14  ;;  %v1908_v7 = vsel %vm3720_vm9, %v4301_v13, %v1876_v56  ;;  %v1879_v6 = vsel %vm3708_vm8, %v4302_v10, 0.0  ;;  %v4313_v14 = vld [vmem:[#allocation26_spill] sm:$0xff] }
 0x416   : > { %v2734_v55 = vpop.eup %2733  ;;  %v1941_v30 = vsel %vm1377_vm3, %v1845_v54, %v1909_v3  ;;  %v1815_v53 = vmul.f32 %v2728_v22, %v1783_v32  ;;  %v1753_v20 = vmul.f32 %v2732_v26, %v3845_v15  ;;  %v3928_v24 = vpop.xlane.xlu1 %1686  ;;  %v4303_v15 = vld [vmem:[#allocation24_spill] sm:$0xff]  ;;  %v1911_v16 = vsel %vm3720_vm9, %v4305_v31, %v1879_v6 }
 0x417   : > { %1973 = vst [vmem:[%s3764_s16 + $0x68] sm:$0xff] %v1941_v30  ;;  %v1940_v41 = vsel %vm1377_vm3, %v1844_v50, %v1908_v7  ;;  %v1814_v33 = vmul.f32 %v2730_v62, %v1782_v25  ;;  %v1752_v44 = vmul.f32 %v2734_v55, %v3851_v34  ;;  %2743 = vrcp.f32 %v3928_v24  ;;  %v3935_v52 = vpop.xlane.xlu0 %1684  ;;  %v4311_v62 = vld [vmem:[#allocation27_spill] sm:$0xff] }
 0x418   : > { %1972 = vst [vmem:[%s3764_s16 + $0x60] sm:$0xff] %v1940_v41  ;;  %v1847_v2 = vmul.f32 %v1815_v53, %v4303_v15  ;;  %v1785_v29 = vsub.f32 2.0, %v1753_v20  ;;  %2745 = vrcp.f32 %v3935_v52  ;;  %v1878_v34 = vsel %vm3708_vm8, %v4304_v58, 0.0  ;;  %v4316_v20 = vld [vmem:[#allocation9_spill] sm:$0xff]  ;;  %v4317_v41 = vld [vmem:[#allocation31_spill] sm:$0xff] }
 0x419   : > { %v2736_v51 = vpop.eup %2735  ;;  %v1846_v43 = vmul.f32 %v1814_v33, %v4306_v46  ;;  %v1784_v21 = vsub.f32 2.0, %v1752_v44  ;;  %v1910_v48 = vsel %vm3720_vm9, %v4307_v8, %v1878_v34  ;;  %v1881_v22 = vsel %vm3708_vm8, %v4308_v1, 0.0  ;;  %v4318_v44 = vld [vmem:[#allocation33_spill] sm:$0xff]  ;;  %v4321_v8 = vld [vmem:[#allocation36_spill] sm:$0xff] }
 0x41a   : > { %v2738_v45 = vpop.eup %2737  ;;  %v1943_v9 = vsel %vm1377_vm3, %v1847_v2, %v1911_v16  ;;  %v1817_v61 = vmul.f32 %v2732_v26, %v1785_v29  ;;  %v1755_v42 = vmul.f32 %v2736_v51, %v3872_v12  ;;  %v3956_v40 = vpop.xlane.xlu1 %1690  ;;  %v4309_v12 = vld [vmem:[#allocation28_spill] sm:$0xff]  ;;  %v1913_v36 = vsel %vm3720_vm9, %v4311_v62, %v1881_v22  ;;  %v4319_v29 = vld [vmem:[#allocation30_spill] sm:$0xff] }
 0x41b   : > { %1975 = vst [vmem:[%s3764_s16 + $0x78] sm:$0xff] %v1943_v9  ;;  %v1942_v60 = vsel %vm1377_vm3, %v1846_v43, %v1910_v48  ;;  %v1816_v11 = vmul.f32 %v2734_v55, %v1784_v21  ;;  %v1754_v38 = vmul.f32 %v2738_v45, %v3879_v5  ;;  %2747 = vrcp.f32 %v3956_v40  ;;  %v3963_v28 = vpop.xlane.xlu0 %1688  ;;  %v4314_v55 = vld [vmem:[#allocation10_spill] sm:$0xff] }
 0x41c   : > { %1974 = vst [vmem:[%s3764_s16 + $0x70] sm:$0xff] %v1942_v60  ;;  %v1849_v59 = vmul.f32 %v1817_v61, %v4309_v12  ;;  %v1787_v47 = vsub.f32 2.0, %v1755_v42  ;;  %2749 = vrcp.f32 %v3963_v28  ;;  %v1880_v5 = vsel %vm3708_vm8, %v4310_v19, 0.0  ;;  %v4322_v42 = vld [vmem:[#allocation11_spill] sm:$0xff] }
 0x41d   : > { %v2740_v57 = vpop.eup %2739  ;;  %v1848_v0 = vmul.f32 %v1816_v11, %v4312_v37  ;;  %v1786_v35 = vsub.f32 2.0, %v1754_v38  ;;  %v1912_v17 = vsel %vm3720_vm9, %v4313_v14, %v1880_v5  ;;  %v1883_v30 = vsel %vm3708_vm8, %v4314_v55, 0.0  ;;  %v4323_v11 = vld [vmem:[#allocation35_spill] sm:$0xff]  ;;  %v4324_v38 = vld [vmem:[#allocation37_spill] sm:$0xff]  ;;  %v4327_v14 = vld [vmem:[#allocation40_spill] sm:$0xff] }
 0x41e   : > { %v2742_v27 = vpop.eup %2741  ;;  %v1945_v4 = vsel %vm1377_vm3, %v1849_v59, %v1913_v36  ;;  %v1819_v54 = vmul.f32 %v2736_v51, %v1787_v47  ;;  %v1757_v32 = vmul.f32 %v2740_v57, %v3900_v18  ;;  %v3984_v26 = vpop.xlane.xlu1 %1694  ;;  %v4315_v18 = vld [vmem:[#allocation32_spill] sm:$0xff]  ;;  %v1915_v33 = vsel %vm3720_vm9, %v4317_v41, %v1883_v30  ;;  %v4325_v47 = vld [vmem:[#allocation34_spill] sm:$0xff] }
 0x41f   : > { %1977 = vst [vmem:[%s3764_s16 + $0x88] sm:$0xff] %v1945_v4  ;;  %v1944_v56 = vsel %vm1377_vm3, %v1848_v0, %v1912_v17  ;;  %v1818_v3 = vmul.f32 %v2738_v45, %v1786_v35  ;;  %v1756_v50 = vmul.f32 %v2742_v27, %v3907_v63  ;;  %2751 = vrcp.f32 %v3984_v26  ;;  %v3991_v25 = vpop.xlane.xlu0 %1692  ;;  %v4320_v45 = vld [vmem:[#allocation12_spill] sm:$0xff] }
 0x420   : > { %1976 = vst [vmem:[%s3764_s16 + $0x80] sm:$0xff] %v1944_v56  ;;  %v1851_v13 = vmul.f32 %v1819_v54, %v4315_v18  ;;  %v1789_v7 = vsub.f32 2.0, %v1757_v32  ;;  %2753 = vrcp.f32 %v3991_v25  ;;  %v1882_v63 = vsel %vm3708_vm8, %v4316_v20, 0.0  ;;  %v4328_v32 = vld [vmem:[#allocation13_spill] sm:$0xff] }
 0x421   : > { %v2744_v53 = vpop.eup %2743  ;;  %v1850_v10 = vmul.f32 %v1818_v3, %v4318_v44  ;;  %v1788_v6 = vsub.f32 2.0, %v1756_v50  ;;  %v1914_v51 = vsel %vm3720_vm9, %v4319_v29, %v1882_v63  ;;  %v1885_v9 = vsel %vm3708_vm8, %v4320_v45, 0.0  ;;  %v4329_v3 = vld [vmem:[#allocation39_spill] sm:$0xff]  ;;  %v4330_v50 = vld [vmem:[#allocation41_spill] sm:$0xff] }
 0x422   : > { %v2746_v15 = vpop.eup %2745  ;;  %v1947_v2 = vsel %vm1377_vm3, %v1851_v13, %v1915_v33  ;;  %v1821_v58 = vmul.f32 %v2740_v57, %v1789_v7  ;;  %v1759_v34 = vmul.f32 %v2744_v53, %v3928_v24  ;;  %v1699_v31 = vpop.xlane.xlu1 %1698  ;;  %v1884_v60 = vsel %vm3708_vm8, %v4322_v42, 0.0  ;;  %v4331_v7 = vld [vmem:[#allocation38_spill] sm:$0xff] }
 0x423   : > { %1979 = vst [vmem:[%s3764_s16 + $0x98] sm:$0xff] %v1947_v2  ;;  %v1946_v16 = vsel %vm1377_vm3, %v1850_v10, %v1914_v51  ;;  %v1820_v46 = vmul.f32 %v2742_v27, %v1788_v6  ;;  %v1758_v43 = vmul.f32 %v2746_v15, %v3935_v52  ;;  %2755 = vrcp.f32 %v1699_v31  ;;  %v1697_v21 = vpop.xlane.xlu0 %1696  ;;  %v4326_v27 = vld [vmem:[#allocation14_spill] sm:$0xff]  ;;  %v4332_v10 = vld [vmem:[#allocation16_spill] sm:$0xff] }
 0x424   : > { %1978 = vst [vmem:[%s3764_s16 + $0x90] sm:$0xff] %v1946_v16  ;;  %v1853_v48 = vmul.f32 %v1821_v58, %v4321_v8  ;;  %v1791_v61 = vsub.f32 2.0, %v1759_v34  ;;  %2757 = vrcp.f32 %v1697_v21  ;;  %v1917_v52 = vsel %vm3720_vm9, %v4323_v11, %v1885_v9  ;;  %v4334_v58 = vld [vmem:[#allocation15_spill] sm:$0xff]  ;;  %v4337_v8 = vld [vmem:[#allocation42_spill] sm:$0xff] }
 0x425   : > { %v2748_v24 = vpop.eup %2747  ;;  %v1852_v1 = vmul.f32 %v1820_v46, %v4324_v38  ;;  %v1790_v22 = vsub.f32 2.0, %v1758_v43  ;;  %v1916_v57 = vsel %vm3720_vm9, %v4325_v47, %v1884_v60  ;;  %v1887_v4 = vsel %vm3708_vm8, %v4326_v27, 0.0  ;;  %v4335_v34 = vld [vmem:[#allocation43_spill] sm:$0xff]  ;;  %v4336_v46 = vld [vmem:[#allocation45_spill] sm:$0xff]  ;;  %v4343_v27 = vld [vmem:[#allocation46_spill] sm:$0xff] }
 0x426   : > { %v2750_v12 = vpop.eup %2749  ;;  %v1949_v59 = vsel %vm1377_vm3, %v1853_v48, %v1917_v52  ;;  %v1823_v19 = vmul.f32 %v2744_v53, %v1791_v61  ;;  %v1761_v5 = vmul.f32 %v2748_v24, %v3956_v40  ;;  %v1703_v62 = vpop.xlane.xlu1 %1702  ;;  %v1886_v56 = vsel %vm3708_vm8, %v4328_v32, 0.0  ;;  %v4338_v52 = vld [vmem:[#allocation18_spill] sm:$0xff]  ;;  %v4340_v47 = vld [vmem:[#allocation17_spill] sm:$0xff] }
 0x427   : > { %1981 = vst [vmem:[%s3764_s16 + $0xa8] sm:$0xff] %v1949_v59  ;;  %v1948_v36 = vsel %vm1377_vm3, %v1852_v1, %v1916_v57  ;;  %v1822_v37 = vmul.f32 %v2746_v15, %v1790_v22  ;;  %v1760_v0 = vmul.f32 %v2750_v12, %v3963_v28  ;;  %2759 = vrcp.f32 %v1703_v62  ;;  %v1701_v35 = vpop.xlane.xlu0 %1700  ;;  %v4333_v15 = vld [vmem:[#allocation44_spill] sm:$0xff]  ;;  %v4341_v57 = vld [vmem:[#allocation47_spill] sm:$0xff] }
 0x428   : > { %1980 = vst [vmem:[%s3764_s16 + $0xa0] sm:$0xff] %v1948_v36  ;;  %v1855_v17 = vmul.f32 %v1823_v19, %v4327_v14  ;;  %v1793_v54 = vsub.f32 2.0, %v1761_v5  ;;  %2761 = vrcp.f32 %v1701_v35  ;;  %v1919_v28 = vsel %vm3720_vm9, %v4329_v3, %v1887_v4  ;;  %v4339_v1 = vld [vmem:[#allocation48_spill] sm:$0xff]  ;;  %v4342_v5 = vld [vmem:[#allocation49_spill] sm:$0xff] }
 0x429   : > { %v2752_v40 = vpop.eup %2751  ;;  %v1854_v55 = vmul.f32 %v1822_v37, %v4330_v50  ;;  %v1792_v30 = vsub.f32 2.0, %v1760_v0  ;;  %v1918_v53 = vsel %vm3720_vm9, %v4331_v7, %v1886_v56  ;;  %v1889_v6 = vsel %vm3708_vm8, %v4332_v10, 0.0  ;;  %v4344_v56 = vld [vmem:[#allocation20_spill] sm:$0xff]  ;;  %v4348_v7 = vld [vmem:[#allocation53_spill] sm:$0xff]  ;;  %v4350_v10 = vld [vmem:[#allocation55_spill] sm:$0xff] }
 0x42a   : > { %v2754_v18 = vpop.eup %2753  ;;  %v1951_v13 = vsel %vm1377_vm3, %v1855_v17, %v1919_v28  ;;  %v1825_v20 = vmul.f32 %v2748_v24, %v1793_v54  ;;  %v1763_v63 = vmul.f32 %v2752_v40, %v3984_v26  ;;  %v1888_v26 = vsel %vm3708_vm8, %v4334_v58, 0.0  ;;  %v4345_v28 = vld [vmem:[#allocation52_spill] sm:$0xff] }
 0x42b   : > { %1983 = vst [vmem:[%s3764_s16 + $0xb8] sm:$0xff] %v1951_v13  ;;  %v1950_v41 = vsel %vm1377_vm3, %v1854_v55, %v1918_v53  ;;  %v1824_v33 = vmul.f32 %v2750_v12, %v1792_v30  ;;  %v1762_v44 = vmul.f32 %v2754_v18, %v3991_v25  ;;  %v1921_v16 = vsel %vm3720_vm9, %v4335_v34, %v1889_v6  ;;  %v4346_v30 = vld [vmem:[#allocation19_spill] sm:$0xff] }
 0x42c   : > { %1982 = vst [vmem:[%s3764_s16 + $0xb0] sm:$0xff] %v1950_v41  ;;  %v1857_v2 = vmul.f32 %v1825_v20, %v4333_v15  ;;  %v1795_v29 = vsub.f32 2.0, %v1763_v63  ;;  %v1920_v48 = vsel %vm3720_vm9, %v4337_v8, %v1888_v26  ;;  %v1891_v38 = vsel %vm3708_vm8, %v4338_v52, 0.0  ;;  %v4349_v63 = vld [vmem:[#allocation50_spill] sm:$0xff]  ;;  %v4351_v15 = vld [vmem:[#allocation57_spill] sm:$0xff] }
 0x42d   : > { %v2756_v51 = vpop.eup %2755  ;;  %v1856_v25 = vmul.f32 %v1824_v33, %v4336_v46  ;;  %v1794_v43 = vsub.f32 2.0, %v1762_v44  ;;  %v1923_v19 = vsel %vm3720_vm9, %v4341_v57, %v1891_v38  ;;  %v1893_v3 = vsel %vm3708_vm8, %v4344_v56, 0.0 }
 0x42e   : > { %v2758_v45 = vpop.eup %2757  ;;  %v1953_v9 = vsel %vm1377_vm3, %v1857_v2, %v1921_v16  ;;  %v1827_v61 = vmul.f32 %v2752_v40, %v1795_v29  ;;  %v1765_v24 = vmul.f32 %v2756_v51, %v1699_v31  ;;  %v1890_v31 = vsel %vm3708_vm8, %v4340_v47, 0.0 }
 0x42f   : > { %1985 = vst [vmem:[%s3764_s16 + $0xc8] sm:$0xff] %v1953_v9  ;;  %v1952_v42 = vsel %vm1377_vm3, %v1856_v25, %v1920_v48  ;;  %v1826_v60 = vmul.f32 %v2754_v18, %v1794_v43  ;;  %v1764_v11 = vmul.f32 %v2758_v45, %v1697_v21  ;;  %v1922_v4 = vsel %vm3720_vm9, %v4343_v27, %v1890_v31  ;;  %v4347_v18 = vld [vmem:[#allocation51_spill] sm:$0xff] }
 0x430   : > { %1984 = vst [vmem:[%s3764_s16 + $0xc0] sm:$0xff] %v1952_v42  ;;  %v1859_v22 = vmul.f32 %v1827_v61, %v4339_v1  ;;  %v1797_v12 = vsub.f32 2.0, %v1765_v24  ;;  %v1925_v13 = vsel %vm3720_vm9, %v4347_v18, %v1893_v3 }
 0x431   : > { %v2760_v59 = vpop.eup %2759  ;;  %v1858_v21 = vmul.f32 %v1826_v60, %v4342_v5  ;;  %v1796_v36 = vsub.f32 2.0, %v1764_v11 }
 0x432   : > { %v2762_v37 = vpop.eup %2761  ;;  %v1955_v0 = vsel %vm1377_vm3, %v1859_v22, %v1923_v19  ;;  %v1829_v14 = vmul.f32 %v2756_v51, %v1797_v12  ;;  %v1767_v17 = vmul.f32 %v2760_v59, %v1703_v62  ;;  %v1892_v62 = vsel %vm3708_vm8, %v4346_v30, 0.0  ;;  %v4353_v51 = vld [vmem:[#allocation54_spill] sm:$0xff] }
 0x433   : > { %1987 = vst [vmem:[%s3764_s16 + $0xd8] sm:$0xff] %v1955_v0  ;;  %v1954_v54 = vsel %vm1377_vm3, %v1858_v21, %v1922_v4  ;;  %v1828_v40 = vmul.f32 %v2758_v45, %v1796_v36  ;;  %v1766_v32 = vmul.f32 %v2762_v37, %v1701_v35  ;;  %v1924_v41 = vsel %vm3720_vm9, %v4349_v63, %v1892_v62 }
 0x434   : > { %1986 = vst [vmem:[%s3764_s16 + $0xd0] sm:$0xff] %v1954_v54  ;;  %v1861_v50 = vmul.f32 %v1829_v14, %v4345_v28  ;;  %v1799_v55 = vsub.f32 2.0, %v1767_v17 }
 0x435   : > { %v1860_v53 = vmul.f32 %v1828_v40, %v4348_v7  ;;  %v1798_v35 = vsub.f32 2.0, %v1766_v32 }
 0x436   : > { %v1957_v20 = vsel %vm1377_vm3, %v1861_v50, %v1925_v13  ;;  %v1831_v33 = vmul.f32 %v2760_v59, %v1799_v55 }
 0x437   : > { %1989 = vst [vmem:[%s3764_s16 + $0xe8] sm:$0xff] %v1957_v20  ;;  %v1956_v23 = vsel %vm1377_vm3, %v1860_v53, %v1924_v41  ;;  %v1830_v44 = vmul.f32 %v2762_v37, %v1798_v35 }
 0x438   : > { %1988 = vst [vmem:[%s3764_s16 + $0xe0] sm:$0xff] %v1956_v23  ;;  %v1863_v6 = vmul.f32 %v1831_v33, %v4350_v10 }
 0x439   : > { %v1862_v2 = vmul.f32 %v1830_v44, %v4351_v15 }
 0x43a   : > { %v1959_v29 = vsel %vm1377_vm3, %v1863_v6, %v4352_v39 }
 0x43b   : > { %1991 = vst [vmem:[%s3764_s16 + $0xf8] sm:$0xff] %v1959_v29  ;;  %v1958_v58 = vsel %vm1377_vm3, %v1862_v2, %v4353_v51 }
 0x43c   : > { %1990 = vst [vmem:[%s3764_s16 + $0xf0] sm:$0xff] %v1958_v58 }
 0x43d   : > { %2776 = shalt.err (!%p2773_p3)
}
 0x43e   : > { %s2777_s9 = scalar_lea.hbm %s4128_s21, 4096  ;;  %s2781_s15 = scalar_lea.hbm %s4190_s7, 8192 }
 0x43f   : > { %p2778_p4 = scmp.ne.s32.totalorder %s4128_s21, %s2777_s9  ;;  %p2782_p9 = scmp.lt.u32.totalorder %s4128_s21, %s4190_s7 }
 0x440   : > { %p2783_p10 = scmp.lt.u32.totalorder %s2781_s15, %s2777_s9  ;;  %p2785_p12 = scmp.lt.u32.totalorder %s2777_s9, %s4128_s21 }
 0x441   : > { %p2779_p7 = pnand %p2778_p4, %p2908_p5 }
 0x442   : > { %p2784_p11 = por %p2783_p10, %p2782_p9 }
 0x443   : > { %p2780_p8 = pneg %p2779_p7 }
 0x444   : > { %p2786_p13 = por %p2785_p12, %p2784_p11 }
 0x446   : > { %p2787_p0 = pnand %p2786_p13, %p2780_p8 }
 0x448   : > { %2790 = shalt.err (!%p2787_p0)
}
 0x449   : > { %s2828_s19 = smov 128   ;;  %s2829_s20 = smov 8  }
 0x44a   : > { %2466 = dma.vmem_to_hbm [thread:$0]  (%p2908_p5), %s4130_s18, 4096, %s4128_s21, %s4142_s28, %s2828_s19, %s2828_s19, %s2829_s20  }
 0x44b PF: > { %p2472_p1 = scmp.ge.s32.totalorder %s2825_s27, 2  ;;  %s2021_s22 = sand.u32 1, %s2813_s24  }
 0x44c   : > { %s2022_s23 = scalar_lea.sflag [#allocation3], %s2021_s22 }
 0x44d   : > { %p2469_p2 = pnand %p2472_p1, %p2912_p6 }
 0x44f   : > { %2808 = dma.done.wait (!%p2469_p2), %s2022_s23, 4096  }
 0x450   : > { %2810 = vsyncadd (!%p2469_p2), %s2022_s23, 4294963200  ;;  %p17_p3 = scmp.ge.s32.totalorder %s2895_s30, 4   ;;  %s4354_s24 = smov %s2817_s25 }
 0x451   : > { %s4355_s25 = smov %s2821_s26  ;;  %s4356_s26 = smov %s2906_s10 }
 0x452   : > { %s4357_s27 = smov %s2895_s30  ;;  %19 = sbr.rel (!%p17_p3) target bundleno = 3 (0x3), region = 83 }
 0x459   :  { %2027 = vsyncpa [#allocation3], 1 }
 0x45a   :  { %2029 = vsyncpa [#allocation3 + $0x1], 1 }

</bundles_post_ra>
